<compile_context>
chip_gen: v6e
topology: v6e:2x2x1
jax: 0.10.0
libtpu: 0.0.40
codegen_flags: <defaults>
</compile_context>

<pallas_src>
import functools

import jax
import jax.numpy as jnp
from jax.experimental import pallas as pl
from jax.experimental.pallas import tpu as pltpu

LANE = 128


# ----------------------------------------------------------------------------
# Fused Pallas kernel: entire Net.forward in one call
# ----------------------------------------------------------------------------
def fused_net_kernel(n, out_ch,                    # static (closed over)
                     lam_ref,                      # SMEM (1,1) f32
                     idx_ref,                      # SMEM (N_pad,) i32  id_new_value_old
                     a_ref,                        # VMEM (2N, N) bf16  [A ; A_b]
                     ds_ref,                       # VMEM (2N, 1) f32   [dS; dS_b]
                     x01_ref,                      # VMEM (2N, Cin_p) bf16 [x0 ; x0_b]
                     w1_ref, b1_ref,               # (Cin_p, H_p) bf16 / (1, H_p) f32
                     w2_ref, b2_ref,               # (H_p, H_p) bf16 / (1, H_p) f32
                     wl_ref, bl_ref,               # (H_p, O_p) bf16 / (1, O_p) f32
                     o_ref,                        # VMEM (N, O_p) f32
                     h1_scr, h1p_scr):             # VMEM (N, H_p) f32 scratch x2
    n_pad = a_ref.shape[1]

    lam = lam_ref[0, 0]
    oml = 1.0 - lam

    a_fwd = a_ref[:n_pad, :]          # A       (bf16)
    a_all = a_ref[...]                # [A;A_b] (bf16)
    ds_fwd = ds_ref[:n_pad, :]        # 1/deg   (f32)
    ds_bwd = ds_ref[n_pad:, :]

    w1 = w1_ref[...]
    w2 = w2_ref[...]
    wl = wl_ref[...]
    b1 = b1_ref[...]
    b2 = b2_ref[...]
    bl = bl_ref[...]

    # ---- layer-1 feature transform: one stacked MXU push [x0 ; x0_b] @ W1 ---
    h_stack = jnp.dot(x01_ref[...], w1, preferred_element_type=jnp.float32)  # (2N, H)
    h0 = h_stack[:n_pad, :]           # x0   @ W1  (f32)
    h0_perm = h_stack[n_pad:, :]      # x0_b @ W1  (f32)

    self1 = ds_fwd * h0 + b1          # shared self-term of x1 and new_x1

    # ---- un-mixed x1 = relu(conv1(x0, x0)) ----------------------------------
    x1 = jnp.maximum(
        jnp.dot(a_fwd, h0.astype(jnp.bfloat16), preferred_element_type=jnp.float32)
        + self1, 0.0)                                                    # (N, H) f32

    # ---- mixed layer 1: hm1 = x0_mix @ W1 by linearity (no extra matmul) ----
    hm1 = (lam * h0 + oml * h0_perm).astype(jnp.bfloat16)
    agg1 = jnp.dot(a_all, hm1, preferred_element_type=jnp.float32)       # (2N, H)
    y1a = jnp.maximum(agg1[:n_pad, :] + self1, 0.0)
    y1b = jnp.maximum(agg1[n_pad:, :] + ds_bwd * h0_perm + b1, 0.0)
    x1_mix = lam * y1a + oml * y1b

    # ---- layer-2 feature transform: one stacked push [x1 ; x1_mix] @ W2 -----
    x2_stack = jnp.concatenate([x1, x1_mix], axis=0).astype(jnp.bfloat16)
    h2_stack = jnp.dot(x2_stack, w2, preferred_element_type=jnp.float32)  # (2N, H)
    h1 = h2_stack[:n_pad, :]          # x1     @ W2 (f32)
    hm2 = h2_stack[n_pad:, :].astype(jnp.bfloat16)                        # x1_mix @ W2

    # ---- exact f32 row gather: h1_perm = h1[id_new_value_old] ---------------
    # (replaces the former dense permutation-matrix matmul)
    h1_scr[...] = h1
    h1p_scr[...] = jnp.zeros_like(h1p_scr)       # keep padded rows finite

    def gather_row(i, carry):
        j = idx_ref[i]
        h1p_scr[pl.ds(i, 1), :] = h1_scr[pl.ds(j, 1), :]
        return carry

    jax.lax.fori_loop(0, n, gather_row, 0)
    h1_perm = h1p_scr[...]

    # ---- mixed layer 2: conv2(x1, x1_mix, A) / conv2(x1_b, x1_mix, A_b) -----
    agg2 = jnp.dot(a_all, hm2, preferred_element_type=jnp.float32)        # (2N, H)
    y2a = jnp.maximum(agg2[:n_pad, :] + ds_fwd * h1 + b2, 0.0)
    y2b = jnp.maximum(agg2[n_pad:, :] + ds_bwd * h1_perm + b2, 0.0)
    x2_mix = lam * y2a + oml * y2b

    # ---- lin + log_softmax over the real (un-padded) classes ----------------
    z = jnp.dot(x2_mix.astype(jnp.bfloat16), wl,
                preferred_element_type=jnp.float32) + bl
    col = jax.lax.broadcasted_iota(jnp.int32, z.shape, dimension=1)
    z = jnp.where(col < out_ch, z, -1e30)                                 # mask pad cols
    m = jnp.max(z, axis=-1, keepdims=True)
    e = jnp.exp(z - m)
    lse = jnp.log(jnp.sum(e, axis=-1, keepdims=True)) + m
    o_ref[...] = z - lse


# ----------------------------------------------------------------------------
# Glue: graph densification, padding, parameter init, forward pass
# ----------------------------------------------------------------------------
def _round_up(x, m):
    return ((x + m - 1) // m) * m


def _pad_to(x, shape):
    return jnp.pad(x, [(0, s - d) for d, s in zip(x.shape, shape)])


def build_norm_adj(edge_index, edge_weight, num_nodes, rw_lmda):
    """Dense symmetric-normalized adjacency (neighbor part) + self-loop norm.

    Built with an O(E) scatter-add (no (E, N) one-hot intermediates).
    """
    src = edge_index[0]
    dst = edge_index[1]
    w = edge_weight.astype(jnp.float32) * rw_lmda
    a = jnp.zeros((num_nodes, num_nodes), jnp.float32).at[dst, src].add(w)
    deg = a.sum(axis=1) + 1.0                                            # +1 self loop
    dinv_sqrt = jax.lax.rsqrt(deg)
    a_norm = dinv_sqrt[:, None] * a * dinv_sqrt[None, :]
    d_self = (1.0 / deg).reshape(num_nodes, 1)
    return a_norm, d_self


def init_params(key, in_channel, hidden, out_channel):
    ks = jax.random.split(key, 8)

    def glorot(k, fan_in, fan_out):
        lim = jnp.sqrt(6.0 / (fan_in + fan_out))
        return jax.random.uniform(k, (fan_in, fan_out), jnp.float32, -lim, lim)

    params = {
        "w1": glorot(ks[0], in_channel, hidden), "b1": jnp.zeros((1, hidden), jnp.float32),
        "w2": glorot(ks[1], hidden, hidden),     "b2": jnp.zeros((1, hidden), jnp.float32),
        # conv3 is defined in __init__ but never used in forward (kept for fidelity)
        "w3": glorot(ks[2], hidden, hidden),     "b3": jnp.zeros((1, hidden), jnp.float32),
        "wl": glorot(ks[3], hidden, out_channel),
        "bl": jax.random.uniform(ks[4], (1, out_channel), jnp.float32, -0.1, 0.1),
    }
    return params


@functools.partial(jax.jit, static_argnames=("rw_lmda",))
def net_forward(params, x0, edge_index, edge_index_b, lam, id_new_value_old,
                edge_weight, rw_lmda):
    n, in_ch = x0.shape
    hid = params["w1"].shape[1]
    out_ch = params["wl"].shape[1]

    # 128-align everything: bf16 sublane groups want 16-row multiples and the
    # adjacency contraction / all output lanes want 128 multiples.
    n_pad = _round_up(n, LANE)
    in_pad = _round_up(in_ch, LANE)
    hid_pad = _round_up(hid, LANE)
    out_pad = _round_up(out_ch, LANE)

    # Dense normalized adjacencies (neighbor part) + self-loop norms.
    a, ds = build_norm_adj(edge_index, edge_weight, n, rw_lmda)
    a_b, ds_b = build_norm_adj(edge_index_b, edge_weight, n, rw_lmda)

    a_stack = jnp.concatenate(
        [_pad_to(a, (n_pad, n_pad)), _pad_to(a_b, (n_pad, n_pad))],
        axis=0).astype(jnp.bfloat16)                                     # (2N, N)
    ds_stack = jnp.concatenate(
        [_pad_to(ds, (n_pad, 1)), _pad_to(ds_b, (n_pad, 1))], axis=0)    # (2N, 1) f32

    # Free XLA gather of the permuted features; stacked with x0 so one MXU
    # weight-load of W1 serves both branches.
    x0_b = x0[id_new_value_old]
    x01 = jnp.concatenate(
        [_pad_to(x0, (n_pad, in_pad)), _pad_to(x0_b, (n_pad, in_pad))],
        axis=0).astype(jnp.bfloat16)                                     # (2N, Cin)

    idx = _pad_to(id_new_value_old.astype(jnp.int32), (n_pad,))          # SMEM table

    w1p = _pad_to(params["w1"], (in_pad, hid_pad)).astype(jnp.bfloat16)
    b1p = _pad_to(params["b1"], (1, hid_pad))
    w2p = _pad_to(params["w2"], (hid_pad, hid_pad)).astype(jnp.bfloat16)
    b2p = _pad_to(params["b2"], (1, hid_pad))
    wlp = _pad_to(params["wl"], (hid_pad, out_pad)).astype(jnp.bfloat16)
    blp = _pad_to(params["bl"], (1, out_pad))

    lam_arr = jnp.asarray(lam, jnp.float32).reshape(1, 1)

    vmem = pl.BlockSpec(memory_space=pltpu.MemorySpace.VMEM)
    smem = pl.BlockSpec(memory_space=pltpu.MemorySpace.SMEM)

    # --- advisory cost estimate (MXU matmuls + softmax transcendentals) ------
    flops = 2 * (2 * n_pad * in_pad * hid_pad          # [x0;x0_b] @ W1
                 + 5 * n_pad * n_pad * hid_pad         # A@h0 + a_all@hm1 + a_all@hm2
                 + 2 * n_pad * hid_pad * hid_pad       # [x1;x1_mix] @ W2
                 + n_pad * hid_pad * out_pad)          # lin
    transcendentals = n_pad * out_pad + n_pad
    in_bytes = (a_stack.size * 2 + ds_stack.size * 4 + x01.size * 2
                + w1p.size * 2 + b1p.size * 4 + w2p.size * 2 + b2p.size * 4
                + wlp.size * 2 + blp.size * 4 + idx.size * 4 + 4)
    out_bytes = n_pad * out_pad * 4
    scratch_bytes = 2 * n_pad * hid_pad * 4

    # --- VMEM budget: explicit headroom, capped at v7x's 64 MiB --------------
    interm_bytes = 48 * n_pad * max(in_pad, hid_pad, out_pad) * 4
    vmem_limit = int(min(max(2 * (in_bytes + out_bytes + scratch_bytes)
                             + interm_bytes, 32 * 1024 * 1024),
                         64 * 1024 * 1024))

    out_padded = pl.pallas_call(
        functools.partial(fused_net_kernel, n, out_ch),
        out_shape=jax.ShapeDtypeStruct((n_pad, out_pad), jnp.float32),
        in_specs=[smem, smem] + [vmem] * 9,
        out_specs=vmem,
        scratch_shapes=[pltpu.VMEM((n_pad, hid_pad), jnp.float32),
                        pltpu.VMEM((n_pad, hid_pad), jnp.float32)],
        compiler_params=pltpu.CompilerParams(vmem_limit_bytes=vmem_limit),
        cost_estimate=pl.CostEstimate(flops=int(flops),
                                      transcendentals=int(transcendentals),
                                      bytes_accessed=int(in_bytes + out_bytes)),
    )(lam_arr, idx, a_stack, ds_stack, x01, w1p, b1p, w2p, b2p, wlp, blp)

    return out_padded[:n, :out_ch]


# Pure-JAX f32 reference of the same forward (for correctness check).
def net_forward_ref(params, x0, edge_index, edge_index_b, lam, id_new_value_old,
                    edge_weight, rw_lmda):
    n = x0.shape[0]
    a, ds = build_norm_adj(edge_index, edge_weight, n, rw_lmda)
    a_b, ds_b = build_norm_adj(edge_index_b, edge_weight, n, rw_lmda)

    def conv(A, D, xs, xm, w, b):
        return A @ (xm @ w) + D * (xs @ w) + b

    x1 = jax.nn.relu(conv(a, ds, x0, x0, params["w1"], params["b1"]))
    x0_b = x0[id_new_value_old]
    x1_b = x1[id_new_value_old]
    x0_mix = x0 * lam + x0_b * (1.0 - lam)
    n1 = jax.nn.relu(conv(a, ds, x0, x0_mix, params["w1"], params["b1"]))
    n1b = jax.nn.relu(conv(a_b, ds_b, x0_b, x0_mix, params["w1"], params["b1"]))
    x1_mix = n1 * lam + n1b * (1.0 - lam)
    n2 = jax.nn.relu(conv(a, ds, x1, x1_mix, params["w2"], params["b2"]))
    n2b = jax.nn.relu(conv(a_b, ds_b, x1_b, x1_mix, params["w2"], params["b2"]))
    x2_mix = n2 * lam + n2b * (1.0 - lam)
    z = x2_mix @ params["wl"] + params["bl"]
    return jax.nn.log_softmax(z, axis=-1)


if __name__ == "__main__":
    N = 64            # number of nodes
    E = 256           # number of edges
    IN_CH = 16
    HIDDEN = 32
    OUT_CH = 8
    RW_LMDA = 0.5
    LAM = 0.7

    key = jax.random.PRNGKey(0)
    k_x, k_e, k_eb, k_w, k_perm, k_params = jax.random.split(key, 6)

    x0 = jax.random.normal(k_x, (N, IN_CH), jnp.float32)
    edge_index = jax.random.randint(k_e, (2, E), 0, N, jnp.int32)
    edge_index_b = jax.random.randint(k_eb, (2, E), 0, N, jnp.int32)
    edge_weight = jax.random.uniform(k_w, (E,), jnp.float32, 0.5, 1.5)
    id_new_value_old = jax.random.permutation(k_perm, N)

    params = init_params(jax.random.PRNGKey(42), IN_CH, HIDDEN, OUT_CH)

    out = net_forward(params, x0, edge_index, edge_index_b, LAM,
                      id_new_value_old, edge_weight, RW_LMDA)
    out = jax.block_until_ready(out)

    assert out.shape == (N, OUT_CH)
    # log_softmax rows must sum (in prob space) to 1
    assert jnp.allclose(jnp.exp(out).sum(-1), 1.0, atol=1e-4)
    # match the pure-f32 reference within bf16-MXU tolerance
    ref = net_forward_ref(params, x0, edge_index, edge_index_b, LAM,
                          id_new_value_old, edge_weight, RW_LMDA)
    assert jnp.allclose(out, ref, atol=2e-1, rtol=5e-2)
    print("KERNEL_OK")
</pallas_src>

<mosaic_0001>
module attributes {stable_mosaic.version = 11 : i64} {
  func.func private @main(%arg0: i32) attributes {dimension_semantics = [#tpu.dimension_semantics<core_parallel>], iteration_bounds = array<i64: 2>, tpu.core_type = #tpu.core_type<sc_scalar_subcore>, window_params = []} {
    return
  }
}

module attributes {stable_mosaic.version = 11 : i64} {
  func.func private @main(%arg0: i32) attributes {dimension_semantics = [#tpu.dimension_semantics<core_parallel>], iteration_bounds = array<i64: 2>, tpu.core_type = #tpu.core_type<sc_scalar_subcore>, window_params = []} {
    return
  }
}

module attributes {stable_mosaic.version = 11 : i64} {
  func.func @fused_net_kernel(%arg0: memref<1x1xf32, #tpu.memory_space<smem>>, %arg1: memref<128xi32, #tpu.memory_space<smem>>, %arg2: memref<256x128xbf16, #tpu.memory_space<vmem>>, %arg3: memref<256x1xf32, #tpu.memory_space<vmem>>, %arg4: memref<256x128xbf16, #tpu.memory_space<vmem>>, %arg5: memref<128x128xbf16, #tpu.memory_space<vmem>>, %arg6: memref<1x128xf32, #tpu.memory_space<vmem>>, %arg7: memref<128x128xbf16, #tpu.memory_space<vmem>>, %arg8: memref<1x128xf32, #tpu.memory_space<vmem>>, %arg9: memref<128x128xbf16, #tpu.memory_space<vmem>>, %arg10: memref<1x128xf32, #tpu.memory_space<vmem>>, %arg11: memref<128x128xf32, #tpu.memory_space<vmem>>, %arg12: memref<128x128xf32, #tpu.memory_space<vmem>>, %arg13: memref<128x128xf32, #tpu.memory_space<vmem>>) attributes {dimension_semantics = [], scalar_prefetch = 0 : i64, scratch_operands = 2 : i64, tpu.core_type = #tpu.core_type<tc>} {
    %c0 = arith.constant 0 : index
    %c0_0 = arith.constant 0 : index
    %0 = memref.load %arg0[%c0, %c0_0] : memref<1x1xf32, #tpu.memory_space<smem>>
    %cst = arith.constant 1.000000e+00 : f32
    %1 = arith.subf %cst, %0 : f32
    %c0_1 = arith.constant 0 : index
    %c0_2 = arith.constant 0 : index
    %2 = vector.load %arg2[%c0_1, %c0_2] : memref<256x128xbf16, #tpu.memory_space<vmem>>, vector<128x128xbf16>
    %c0_3 = arith.constant 0 : index
    %c0_4 = arith.constant 0 : index
    %3 = vector.load %arg2[%c0_3, %c0_4] : memref<256x128xbf16, #tpu.memory_space<vmem>>, vector<256x128xbf16>
    %c0_5 = arith.constant 0 : index
    %c0_6 = arith.constant 0 : index
    %4 = vector.load %arg3[%c0_5, %c0_6] : memref<256x1xf32, #tpu.memory_space<vmem>>, vector<128x1xf32>
    %c128 = arith.constant 128 : index
    %c0_7 = arith.constant 0 : index
    %5 = vector.load %arg3[%c128, %c0_7] : memref<256x1xf32, #tpu.memory_space<vmem>>, vector<128x1xf32>
    %c0_8 = arith.constant 0 : index
    %c0_9 = arith.constant 0 : index
    %6 = vector.load %arg5[%c0_8, %c0_9] : memref<128x128xbf16, #tpu.memory_space<vmem>>, vector<128x128xbf16>
    %c0_10 = arith.constant 0 : index
    %c0_11 = arith.constant 0 : index
    %7 = vector.load %arg7[%c0_10, %c0_11] : memref<128x128xbf16, #tpu.memory_space<vmem>>, vector<128x128xbf16>
    %c0_12 = arith.constant 0 : index
    %c0_13 = arith.constant 0 : index
    %8 = vector.load %arg9[%c0_12, %c0_13] : memref<128x128xbf16, #tpu.memory_space<vmem>>, vector<128x128xbf16>
    %c0_14 = arith.constant 0 : index
    %c0_15 = arith.constant 0 : index
    %9 = vector.load %arg6[%c0_14, %c0_15] : memref<1x128xf32, #tpu.memory_space<vmem>>, vector<1x128xf32>
    %c0_16 = arith.constant 0 : index
    %c0_17 = arith.constant 0 : index
    %10 = vector.load %arg8[%c0_16, %c0_17] : memref<1x128xf32, #tpu.memory_space<vmem>>, vector<1x128xf32>
    %c0_18 = arith.constant 0 : index
    %c0_19 = arith.constant 0 : index
    %11 = vector.load %arg10[%c0_18, %c0_19] : memref<1x128xf32, #tpu.memory_space<vmem>>, vector<1x128xf32>
    %c0_20 = arith.constant 0 : index
    %c0_21 = arith.constant 0 : index
    %12 = vector.load %arg4[%c0_20, %c0_21] : memref<256x128xbf16, #tpu.memory_space<vmem>>, vector<256x128xbf16>
    %cst_22 = arith.constant dense<0.000000e+00> : vector<256x128xf32>
    %13 = tpu.matmul %12, %6, %cst_22 {dimension_numbers = #tpu.dot_dimension_numbers<[1], [0], [0], [1], [0, 0, 1, 1], [], []>} : vector<256x128xbf16>, vector<128x128xbf16>, vector<256x128xf32> -> vector<256x128xf32>
    %14 = vector.extract_strided_slice %13 {offsets = [0, 0], sizes = [128, 128], strides = [1, 1]} : vector<256x128xf32> to vector<128x128xf32>
    %15 = vector.extract_strided_slice %13 {offsets = [128, 0], sizes = [128, 128], strides = [1, 1]} : vector<256x128xf32> to vector<128x128xf32>
    %16 = vector.broadcast %4 : vector<128x1xf32> to vector<128x128xf32>
    %17 = arith.mulf %16, %14 : vector<128x128xf32>
    %18 = vector.broadcast %9 : vector<1x128xf32> to vector<128x128xf32>
    %19 = arith.addf %17, %18 : vector<128x128xf32>
    %20 = arith.truncf %14 : vector<128x128xf32> to vector<128x128xbf16>
    %cst_23 = arith.constant dense<0.000000e+00> : vector<128x128xf32>
    %21 = tpu.matmul %2, %20, %cst_23 {dimension_numbers = #tpu.dot_dimension_numbers<[1], [0], [0], [1], [0, 0, 1, 1], [], []>} : vector<128x128xbf16>, vector<128x128xbf16>, vector<128x128xf32> -> vector<128x128xf32>
    %22 = arith.addf %21, %19 : vector<128x128xf32>
    %cst_24 = arith.constant 0.000000e+00 : f32
    %23 = vector.broadcast %cst_24 : f32 to vector<128x128xf32>
    %24 = arith.maximumf %22, %23 : vector<128x128xf32>
    %25 = vector.broadcast %0 : f32 to vector<128x128xf32>
    %26 = arith.mulf %25, %14 : vector<128x128xf32>
    %27 = vector.broadcast %1 : f32 to vector<128x128xf32>
    %28 = arith.mulf %27, %15 : vector<128x128xf32>
    %29 = arith.addf %26, %28 : vector<128x128xf32>
    %30 = arith.truncf %29 : vector<128x128xf32> to vector<128x128xbf16>
    %cst_25 = arith.constant dense<0.000000e+00> : vector<256x128xf32>
    %31 = tpu.matmul %3, %30, %cst_25 {dimension_numbers = #tpu.dot_dimension_numbers<[1], [0], [0], [1], [0, 0, 1, 1], [], []>} : vector<256x128xbf16>, vector<128x128xbf16>, vector<256x128xf32> -> vector<256x128xf32>
    %32 = vector.extract_strided_slice %31 {offsets = [0, 0], sizes = [128, 128], strides = [1, 1]} : vector<256x128xf32> to vector<128x128xf32>
    %33 = arith.addf %32, %19 : vector<128x128xf32>
    %cst_26 = arith.constant 0.000000e+00 : f32
    %34 = vector.broadcast %cst_26 : f32 to vector<128x128xf32>
    %35 = arith.maximumf %33, %34 : vector<128x128xf32>
    %36 = vector.extract_strided_slice %31 {offsets = [128, 0], sizes = [128, 128], strides = [1, 1]} : vector<256x128xf32> to vector<128x128xf32>
    %37 = vector.broadcast %5 : vector<128x1xf32> to vector<128x128xf32>
    %38 = arith.mulf %37, %15 : vector<128x128xf32>
    %39 = arith.addf %36, %38 : vector<128x128xf32>
    %40 = vector.broadcast %9 : vector<1x128xf32> to vector<128x128xf32>
    %41 = arith.addf %39, %40 : vector<128x128xf32>
    %cst_27 = arith.constant 0.000000e+00 : f32
    %42 = vector.broadcast %cst_27 : f32 to vector<128x128xf32>
    %43 = arith.maximumf %41, %42 : vector<128x128xf32>
    %44 = vector.broadcast %0 : f32 to vector<128x128xf32>
    %45 = arith.mulf %44, %35 : vector<128x128xf32>
    %46 = vector.broadcast %1 : f32 to vector<128x128xf32>
    %47 = arith.mulf %46, %43 : vector<128x128xf32>
    %48 = arith.addf %45, %47 : vector<128x128xf32>
    %49 = tpu.concatenate %24, %48 in 0 : vector<128x128xf32>, vector<128x128xf32> -> vector<256x128xf32>
    %50 = arith.truncf %49 : vector<256x128xf32> to vector<256x128xbf16>
    %cst_28 = arith.constant dense<0.000000e+00> : vector<256x128xf32>
    %51 = tpu.matmul %50, %7, %cst_28 {dimension_numbers = #tpu.dot_dimension_numbers<[1], [0], [0], [1], [0, 0, 1, 1], [], []>} : vector<256x128xbf16>, vector<128x128xbf16>, vector<256x128xf32> -> vector<256x128xf32>
    %52 = vector.extract_strided_slice %51 {offsets = [0, 0], sizes = [128, 128], strides = [1, 1]} : vector<256x128xf32> to vector<128x128xf32>
    %53 = vector.extract_strided_slice %51 {offsets = [128, 0], sizes = [128, 128], strides = [1, 1]} : vector<256x128xf32> to vector<128x128xf32>
    %54 = arith.truncf %53 : vector<128x128xf32> to vector<128x128xbf16>
    %c0_29 = arith.constant 0 : index
    %c0_30 = arith.constant 0 : index
    %55 = vector.load %arg12[%c0_29, %c0_30] : memref<128x128xf32, #tpu.memory_space<vmem>>, vector<128x128xf32>
    tpu.vector_store %arg12[%c0_29, %c0_30], %52 {strides = array<i32>} : memref<128x128xf32, #tpu.memory_space<vmem>>, vector<128x128xf32>,
    %cst_31 = arith.constant 0.000000e+00 : f32
    %56 = vector.broadcast %cst_31 : f32 to vector<128x128xf32>
    %c0_32 = arith.constant 0 : index
    %c0_33 = arith.constant 0 : index
    %57 = vector.load %arg13[%c0_32, %c0_33] : memref<128x128xf32, #tpu.memory_space<vmem>>, vector<128x128xf32>
    tpu.vector_store %arg13[%c0_32, %c0_33], %56 {strides = array<i32>} : memref<128x128xf32, #tpu.memory_space<vmem>>, vector<128x128xf32>,
    %c0_i32 = arith.constant 0 : i32
    %c64_i32 = arith.constant 64 : i32
    %58 = arith.addi %c0_i32, %c64_i32 : i32
    %c1_i32 = arith.constant 1 : i32
    scf.for %arg14 = %c0_i32 to %58 step %c1_i32  : i32 {
      %103 = arith.index_cast %arg14 : i32 to index
      %104 = memref.load %arg1[%103] : memref<128xi32, #tpu.memory_space<smem>>
      %105 = arith.index_cast %104 : i32 to index
      %c0_46 = arith.constant 0 : index
      %106 = vector.load %arg12[%105, %c0_46] : memref<128x128xf32, #tpu.memory_space<vmem>>, vector<1x128xf32>
      %107 = arith.index_cast %arg14 : i32 to index
      %c0_47 = arith.constant 0 : index
      %108 = vector.load %arg13[%107, %c0_47] : memref<128x128xf32, #tpu.memory_space<vmem>>, vector<1x128xf32>
      tpu.vector_store %arg13[%107, %c0_47], %106 {strides = array<i32>} : memref<128x128xf32, #tpu.memory_space<vmem>>, vector<1x128xf32>,
    }
    %c64_i32_34 = arith.constant 64 : i32
    %c0_35 = arith.constant 0 : index
    %c0_36 = arith.constant 0 : index
    %59 = vector.load %arg13[%c0_35, %c0_36] : memref<128x128xf32, #tpu.memory_space<vmem>>, vector<128x128xf32>
    %cst_37 = arith.constant dense<0.000000e+00> : vector<256x128xf32>
    %60 = tpu.matmul %3, %54, %cst_37 {dimension_numbers = #tpu.dot_dimension_numbers<[1], [0], [0], [1], [0, 0, 1, 1], [], []>} : vector<256x128xbf16>, vector<128x128xbf16>, vector<256x128xf32> -> vector<256x128xf32>
    %61 = vector.extract_strided_slice %60 {offsets = [0, 0], sizes = [128, 128], strides = [1, 1]} : vector<256x128xf32> to vector<128x128xf32>
    %62 = vector.broadcast %4 : vector<128x1xf32> to vector<128x128xf32>
    %63 = arith.mulf %62, %52 : vector<128x128xf32>
    %64 = arith.addf %61, %63 : vector<128x128xf32>
    %65 = vector.broadcast %10 : vector<1x128xf32> to vector<128x128xf32>
    %66 = arith.addf %64, %65 : vector<128x128xf32>
    %cst_38 = arith.constant 0.000000e+00 : f32
    %67 = vector.broadcast %cst_38 : f32 to vector<128x128xf32>
    %68 = arith.maximumf %66, %67 : vector<128x128xf32>
    %69 = vector.extract_strided_slice %60 {offsets = [128, 0], sizes = [128, 128], strides = [1, 1]} : vector<256x128xf32> to vector<128x128xf32>
    %70 = vector.broadcast %5 : vector<128x1xf32> to vector<128x128xf32>
    %71 = arith.mulf %70, %59 : vector<128x128xf32>
    %72 = arith.addf %69, %71 : vector<128x128xf32>
    %73 = vector.broadcast %10 : vector<1x128xf32> to vector<128x128xf32>
    %74 = arith.addf %72, %73 : vector<128x128xf32>
    %cst_39 = arith.constant 0.000000e+00 : f32
    %75 = vector.broadcast %cst_39 : f32 to vector<128x128xf32>
    %76 = arith.maximumf %74, %75 : vector<128x128xf32>
    %77 = vector.broadcast %0 : f32 to vector<128x128xf32>
    %78 = arith.mulf %77, %68 : vector<128x128xf32>
    %79 = vector.broadcast %1 : f32 to vector<128x128xf32>
    %80 = arith.mulf %79, %76 : vector<128x128xf32>
    %81 = arith.addf %78, %80 : vector<128x128xf32>
    %82 = arith.truncf %81 : vector<128x128xf32> to vector<128x128xbf16>
    %cst_40 = arith.constant dense<0.000000e+00> : vector<128x128xf32>
    %83 = tpu.matmul %82, %8, %cst_40 {dimension_numbers = #tpu.dot_dimension_numbers<[1], [0], [0], [1], [0, 0, 1, 1], [], []>} : vector<128x128xbf16>, vector<128x128xbf16>, vector<128x128xf32> -> vector<128x128xf32>
    %84 = vector.broadcast %11 : vector<1x128xf32> to vector<128x128xf32>
    %85 = arith.addf %83, %84 : vector<128x128xf32>
    %86 = tpu.iota {dimensions = array<i32: 1>} : vector<128x128xi32>
    %c8_i32 = arith.constant 8 : i32
    %87 = vector.broadcast %c8_i32 : i32 to vector<128x128xi32>
    %88 = arith.cmpi slt, %86, %87 : vector<128x128xi32>
    %cst_41 = arith.constant -1.000000e+30 : f32
    %89 = vector.broadcast %cst_41 : f32 to vector<128x128xf32>
    %90 = arith.select %88, %85, %89 : vector<128x128xi1>, vector<128x128xf32>
    %cst_42 = arith.constant dense<0xFF800000> : vector<128xf32>
    %91 = vector.multi_reduction <maximumf>, %90, %cst_42 [1] : vector<128x128xf32> to vector<128xf32>
    %92 = vector.shape_cast %91 : vector<128xf32> to vector<128x1xf32>
    %93 = vector.broadcast %92 : vector<128x1xf32> to vector<128x128xf32>
    %94 = arith.subf %90, %93 : vector<128x128xf32>
    %95 = math.exp %94 : vector<128x128xf32>
    %cst_43 = arith.constant dense<0.000000e+00> : vector<128xf32>
    %96 = vector.multi_reduction <add>, %95, %cst_43 [1] : vector<128x128xf32> to vector<128xf32>
    %97 = vector.shape_cast %96 : vector<128xf32> to vector<128x1xf32>
    %98 = math.log %97 : vector<128x1xf32>
    %99 = arith.addf %98, %92 : vector<128x1xf32>
    %100 = vector.broadcast %99 : vector<128x1xf32> to vector<128x128xf32>
    %101 = arith.subf %90, %100 : vector<128x128xf32>
    %c0_44 = arith.constant 0 : index
    %c0_45 = arith.constant 0 : index
    %102 = vector.load %arg11[%c0_44, %c0_45] : memref<128x128xf32, #tpu.memory_space<vmem>>, vector<128x128xf32>
    tpu.vector_store %arg11[%c0_44, %c0_45], %101 {strides = array<i32>} : memref<128x128xf32, #tpu.memory_space<vmem>>, vector<128x128xf32>,
    return
  }
}

</mosaic_0001>

<bundles_post_ra>
// kernel: net_forward.1
= control target key start
LH: loop header
LB: loop body
LE: loop exit
PB: predicated region body
PF: predicated region fallthrough
CT: control target
= control target key end

     0   :  { %17 = vsyncpa [#allocation6], 0  ;;  %s4428_s0 = inlined_call_operand.<no memory space> [shape: f32[1,1], index: 0, kind: input, shape index: {}]   ;;  %s4429_s1 = inlined_call_operand.vmem [shape: s32[128], index: 1, kind: input, shape index: {}]   ;;  %s4430_s2 = inlined_call_operand.vmem [shape: bf16[256,128], index: 2, kind: input, shape index: {}]   ;;  %s4431_s3 = inlined_call_operand.vmem [shape: f32[256,1], index: 3, kind: input, shape index: {}]   ;;  %s4432_s4 = inlined_call_operand.vmem [shape: bf16[256,128], index: 4, kind: input, shape index: {}]   ;;  %s4433_s5 = inlined_call_operand.vmem [shape: bf16[128,128], index: 5, kind: input, shape index: {}]   ;;  %s4434_s6 = inlined_call_operand.vmem [shape: f32[1,128], index: 6, kind: input, shape index: {}]   ;;  %s4435_s7 = inlined_call_operand.vmem [shape: bf16[128,128], index: 7, kind: input, shape index: {}]   ;;  %s4436_s8 = inlined_call_operand.vmem [shape: f32[1,128], index: 8, kind: input, shape index: {}]   ;;  %s4437_s9 = inlined_call_operand.vmem [shape: bf16[128,128], index: 9, kind: input, shape index: {}]   ;;  %s4438_s10 = inlined_call_operand.vmem [shape: f32[1,128], index: 10, kind: input, shape index: {}]   ;;  %s4439_s11 = inlined_call_operand.vmem [shape: f32[128,128], index: 11, kind: output, shape index: {}]  }
   0x1   :  { %s26_s19 = sshll.u32 %s4429_s1, 4  ;;  %s27_s19 = int_to_ptr.vmem [resolvable:$true] %s26_s19 }
   0x2   :  { %s2950_s20 = scalar_lea.vmem %s27_s19, 16  ;;  %p2955_p1 = scmp.lt.s32.totalorder %s27_s19, %s27_s19 }
   0x3   :  { %p2951_p0 = scmp.ne.s32.totalorder %s27_s19, %s2950_s20  ;;  %p2956_p2 = scmp.lt.s32.totalorder %s2950_s20, %s2950_s20 }
   0x5   :  { %p2957_p3 = por %p2956_p2, %p2955_p1 }
   0x7   :  { %p2958_p4 = pnand %p2957_p3, %p2951_p0 }
   0x9   :  { %2961 = shalt.err (!%p2958_p4)
}
   0xa   :  { %s2972_s21 = smov [#allocation5]  }
   0xb   :  { %29 = dma.vmem_to_smem %s27_s19, 16, %s2972_s21, [#allocation6]  }
   0xc   :  { %2966 = dma.done.wait [#allocation6], 16  }
   0xd   :  { %2967 = vsyncadd [#allocation6], 4294967280 }
   0xe   :  { %51 = sfence }
   0xf   :  { %v3041_v0 = vld [vmem:[%s4437_s9] sm:$0xf]  ;;  %v3046_v1 = vld [vmem:[%s4437_s9 + $0x4] sm:$0xf]  ;;  %v3051_v2 = vld [vmem:[%s4437_s9 + $0x8] sm:$0xf] }
  0x10   :  { %4481 = vst [vmem:[#allocation8_spill] sm:$0xff] %v3041_v0  ;;  %4482 = vst [vmem:[#allocation9_spill] sm:$0xff] %v3046_v1  ;;  %v3056_v3 = vld [vmem:[%s4437_s9 + $0xc] sm:$0xf]  ;;  %v3061_v4 = vld [vmem:[%s4437_s9 + $0x10] sm:$0xf] }
  0x11   :  { %4483 = vst [vmem:[#allocation10_spill] sm:$0xff] %v3051_v2  ;;  %4484 = vst [vmem:[#allocation11_spill] sm:$0xff] %v3056_v3  ;;  %v3066_v5 = vld [vmem:[%s4437_s9 + $0x14] sm:$0xf]  ;;  %v3071_v6 = vld [vmem:[%s4437_s9 + $0x18] sm:$0xf] }
  0x12   :  { %4485 = vst [vmem:[#allocation12_spill] sm:$0xff] %v3061_v4  ;;  %4486 = vst [vmem:[#allocation13_spill] sm:$0xff] %v3066_v5  ;;  %v3076_v7 = vld [vmem:[%s4437_s9 + $0x1c] sm:$0xf]  ;;  %v3081_v8 = vld [vmem:[%s4437_s9 + $0x20] sm:$0xf] }
  0x13   :  { %4487 = vst [vmem:[#allocation14_spill] sm:$0xff] %v3071_v6  ;;  %4488 = vst [vmem:[#allocation15_spill] sm:$0xff] %v3076_v7  ;;  %v3086_v9 = vld [vmem:[%s4437_s9 + $0x24] sm:$0xf]  ;;  %v3091_v10 = vld [vmem:[%s4437_s9 + $0x28] sm:$0xf] }
  0x14   :  { %4489 = vst [vmem:[#allocation16_spill] sm:$0xff] %v3081_v8  ;;  %4490 = vst [vmem:[#allocation17_spill] sm:$0xff] %v3086_v9  ;;  %v3096_v11 = vld [vmem:[%s4437_s9 + $0x2c] sm:$0xf]  ;;  %v3101_v12 = vld [vmem:[%s4437_s9 + $0x30] sm:$0xf] }
  0x15   :  { %4491 = vst [vmem:[#allocation18_spill] sm:$0xff] %v3091_v10  ;;  %4492 = vst [vmem:[#allocation19_spill] sm:$0xff] %v3096_v11  ;;  %v3106_v13 = vld [vmem:[%s4437_s9 + $0x34] sm:$0xf]  ;;  %v3111_v14 = vld [vmem:[%s4437_s9 + $0x38] sm:$0xf] }
  0x16   :  { %4493 = vst [vmem:[#allocation20_spill] sm:$0xff] %v3101_v12  ;;  %4494 = vst [vmem:[#allocation21_spill] sm:$0xff] %v3106_v13  ;;  %v3116_v15 = vld [vmem:[%s4437_s9 + $0x3c] sm:$0xf]  ;;  %v3121_v16 = vld [vmem:[%s4436_s8] ss:$0 sm:$0xff] }
  0x17   :  { %4495 = vst [vmem:[#allocation22_spill] sm:$0xff] %v3111_v14  ;;  %4496 = vst [vmem:[#allocation23_spill] sm:$0xff] %v3116_v15  ;;  %v2830_v17 = vld [vmem:[%s4433_s5 + $0x38] sm:$0xff]   ;;  %v2831_v18 = vld [vmem:[%s4433_s5 + $0x30] sm:$0xff]   ;;  %v2973_v19 = vmov 0   ;;  %s54_s9 = ssub.f32 1.0, %s4428_s0 }
  0x18   :  { %4497 = vst [vmem:[#allocation24_spill] sm:$0xff] %v3121_v16  ;;  %2828 = vset.pattern.permute.xlu0 %v2973_v19  ;;  %2829 = vset.pattern.permute.xlu1 %v2973_v19  ;;  %v2832_v20 = vld [vmem:[%s4433_s5 + $0x28] sm:$0xff]   ;;  %v2833_v21 = vld [vmem:[%s4433_s5 + $0x20] sm:$0xff]   ;;  %v2834_v23 = vld [vmem:[%s4433_s5 + $0x18] sm:$0xff]  }
  0x19   :  { %2561 = vmatprep.subr.bf16.mxu0 %v2830_v17  ;;  %v2838_v22 = vld [vmem:[%s4432_s4] sm:$0xff]   ;;  %v2835_v24 = vld [vmem:[%s4433_s5 + $0x10] sm:$0xff]   ;;  %v2836_v25 = vld [vmem:[%s4433_s5 + $0x8] sm:$0xff]  }
  0x1a   :  { %2562 = vmatpush3.bf16.msra.mxu0 %v2830_v17  ;;  %2577 = vmatprep.mubr.bf16.mxu0 %v2838_v22  ;;  %v103_v26 = vld [vmem:[%s4431_s3] sm:$0xff]  ;;  %v105_v28 = vld [vmem:[%s4431_s3 + $0x10] sm:$0xff]  ;;  %v104_v29 = vld [vmem:[%s4431_s3 + $0x8] sm:$0xff] }
  0x1b   :  { %2563 = vmatprep.subr.bf16.mxu0 %v2831_v18  ;;  %v2837_v27 = vld [vmem:[%s4433_s5] sm:$0xff]   ;;  %525 = vperm.xlu0 %2828, %v103_v26   ;;  %v106_v30 = vld [vmem:[%s4431_s3 + $0x18] sm:$0xff]  ;;  %v2839_v32 = vld [vmem:[%s4432_s4 + $0x8] sm:$0xff]  }
  0x1c   :  { %535 = vperm.xlu1 %2829, %v105_v28   ;;  %v107_v31 = vld [vmem:[%s4431_s3 + $0x20] sm:$0xff]  ;;  %v108_v33 = vld [vmem:[%s4431_s3 + $0x28] sm:$0xff]  ;;  %v2840_v34 = vld [vmem:[%s4432_s4 + $0x10] sm:$0xff]  }
  0x1d   :  { %v109_v35 = vld [vmem:[%s4431_s3 + $0x30] sm:$0xff]  ;;  %v110_v36 = vld [vmem:[%s4431_s3 + $0x38] sm:$0xff]  ;;  %v111_v37 = vld [vmem:[%s4431_s3 + $0x40] sm:$0xff] }
  0x1e   :  { %2564 = vmatpush3.bf16.msra.mxu0 %v2831_v18  ;;  %v2841_v38 = vld [vmem:[%s4432_s4 + $0x18] sm:$0xff]   ;;  %v112_v39 = vld [vmem:[%s4431_s3 + $0x48] sm:$0xff]  ;;  %v2842_v40 = vld [vmem:[%s4432_s4 + $0x20] sm:$0xff]  }
  0x1f   :  { %2565 = vmatprep.subr.bf16.mxu0 %v2832_v20  ;;  %530 = vperm.xlu0 %2828, %v104_v29   ;;  %v113_v41 = vld [vmem:[%s4431_s3 + $0x50] sm:$0xff]  ;;  %v114_v42 = vld [vmem:[%s4431_s3 + $0x58] sm:$0xff]  ;;  %v115_v43 = vld [vmem:[%s4431_s3 + $0x60] sm:$0xff] }
  0x20   :  { %540 = vperm.xlu1 %2829, %v106_v30   ;;  %v2843_v44 = vld [vmem:[%s4432_s4 + $0x28] sm:$0xff]   ;;  %v2844_v46 = vld [vmem:[%s4432_s4 + $0x30] sm:$0xff]   ;;  %v118_v48 = vld [vmem:[%s4431_s3 + $0x78] sm:$0xff] }
  0x21   :  { %v116_v45 = vld [vmem:[%s4431_s3 + $0x68] sm:$0xff]  ;;  %v117_v47 = vld [vmem:[%s4431_s3 + $0x70] sm:$0xff]  ;;  %v119_v49 = vld [vmem:[%s4431_s3 + $0x80] sm:$0xff] }
  0x22   :  { %2566 = vmatpush3.bf16.msra.mxu0 %v2832_v20  ;;  %v2845_v50 = vld [vmem:[%s4432_s4 + $0x38] sm:$0xff]   ;;  %v120_v51 = vld [vmem:[%s4431_s3 + $0x88] sm:$0xff]  ;;  %v2846_v52 = vld [vmem:[%s4432_s4 + $0x40] sm:$0xff]  }
  0x23   :  { %2567 = vmatprep.subr.bf16.mxu0 %v2833_v21  ;;  %545 = vperm.xlu0 %2828, %v107_v31   ;;  %v121_v53 = vld [vmem:[%s4431_s3 + $0x90] sm:$0xff]  ;;  %v122_v54 = vld [vmem:[%s4431_s3 + $0x98] sm:$0xff]  ;;  %v123_v55 = vld [vmem:[%s4431_s3 + $0xa0] sm:$0xff] }
  0x24   :  { %550 = vperm.xlu1 %2829, %v108_v33   ;;  %v2847_v56 = vld [vmem:[%s4432_s4 + $0x48] sm:$0xff]   ;;  %v2848_v58 = vld [vmem:[%s4432_s4 + $0x50] sm:$0xff]   ;;  %v126_v60 = vld [vmem:[%s4431_s3 + $0xb8] sm:$0xff] }
  0x25   :  { %v124_v57 = vld [vmem:[%s4431_s3 + $0xa8] sm:$0xff]  ;;  %v125_v59 = vld [vmem:[%s4431_s3 + $0xb0] sm:$0xff]  ;;  %v127_v61 = vld [vmem:[%s4431_s3 + $0xc0] sm:$0xff] }
  0x26   :  { %2568 = vmatpush3.bf16.msra.mxu0 %v2833_v21  ;;  %v2849_v62 = vld [vmem:[%s4432_s4 + $0x58] sm:$0xff]   ;;  %v128_v63 = vld [vmem:[%s4431_s3 + $0xc8] sm:$0xff]  ;;  %v2850_v17 = vld [vmem:[%s4432_s4 + $0x60] sm:$0xff]  }
  0x27   :  { %2569 = vmatprep.subr.bf16.mxu0 %v2834_v23  ;;  %555 = vperm.xlu0 %2828, %v109_v35   ;;  %v129_v18 = vld [vmem:[%s4431_s3 + $0xd0] sm:$0xff]  ;;  %v130_v19 = vld [vmem:[%s4431_s3 + $0xd8] sm:$0xff]  ;;  %v131_v20 = vld [vmem:[%s4431_s3 + $0xe0] sm:$0xff] }
  0x28   :  { %560 = vperm.xlu1 %2829, %v110_v36   ;;  %v2851_v21 = vld [vmem:[%s4432_s4 + $0x68] sm:$0xff]   ;;  %v2853_v26 = vld [vmem:[%s4432_s4 + $0x78] sm:$0xff]   ;;  %v3622_v11 = vld [vmem:[%s4434_s6] ss:$0 sm:$0xff]  ;;  %s2968_s6 = smov 0  }
  0x29   :  { %v132_v22 = vld [vmem:[%s4431_s3 + $0xe8] sm:$0xff] }
  0x2a   :  { %2570 = vmatpush3.bf16.msra.mxu0 %v2834_v23  ;;  %v2852_v23 = vld [vmem:[%s4432_s4 + $0x70] sm:$0xff]  }
  0x2b   :  { %2571 = vmatprep.subr.bf16.mxu0 %v2835_v24  ;;  %565 = vperm.xlu0 %2828, %v111_v37  }
  0x2c   :  { %570 = vperm.xlu1 %2829, %v112_v39  }
  0x2e   :  { %2572 = vmatpush3.bf16.msra.mxu0 %v2835_v24  ;;  %v133_v24 = vld [vmem:[%s4431_s3 + $0xf0] sm:$0xff] }
  0x2f   :  { %2573 = vmatprep.subr.bf16.mxu0 %v2836_v25  ;;  %575 = vperm.xlu0 %2828, %v113_v41  }
  0x30   :  { %580 = vperm.xlu1 %2829, %v114_v42   ;;  %v2878_v42 = vld [vmem:[%s4435_s7 + $0x38] sm:$0xff]  }
  0x32   :  { %2574 = vmatpush3.bf16.msra.mxu0 %v2836_v25  ;;  %v134_v25 = vld [vmem:[%s4431_s3 + $0xf8] sm:$0xff] }
  0x33   :  { %2575 = vmatprep.subr.bf16.mxu0 %v2837_v27  ;;  %585 = vperm.xlu0 %2828, %v115_v43   ;;  %v2879_v43 = vld [vmem:[%s4435_s7 + $0x30] sm:$0xff]  }
  0x34   :  { %590 = vperm.xlu1 %2829, %v116_v45  }
  0x36   :  { %2576 = vmatpush3.bf16.msra.mxu0 %v2837_v27  ;;  %v2854_v27 = vld [vmem:[%s4430_s2] sm:$0xff]  }
  0x37   :  { %595 = vperm.xlu0 %2828, %v117_v47   ;;  %2625 = vmatprep.mubr.bf16.mxu1 %v2854_v27 }
  0x38   :  { %600 = vperm.xlu1 %2829, %v118_v48   ;;  %2689 = vmatprep.subr.bf16.mxu0 %v2878_v42  ;;  %v2880_v48 = vld [vmem:[%s4435_s7 + $0x28] sm:$0xff]  }
  0x39   :  { %2578 = vmatmul.mubr.bf16.vlgmr.msra.gmra.mxu0 %v2839_v32 }
  0x3a   :  { %2581 = vmatprep.mubr.bf16.mxu0 %v2840_v34  ;;  %2690 = vmatpush3.bf16.msra.mxu0 %v2878_v42 }
  0x3b   :  { %1159 = vperm.xlu0 %2828, %v119_v49   ;;  %2691 = vmatprep.subr.bf16.mxu0 %v2879_v43 }
  0x3c   :  { %1164 = vperm.xlu1 %2829, %v120_v51   ;;  %v3349_v51 = vstv %s4428_s0 }
  0x3e   :  { %2692 = vmatpush3.bf16.msra.mxu0 %v2879_v43 }
  0x3f   :  { %1169 = vperm.xlu0 %2828, %v121_v53   ;;  %2693 = vmatprep.subr.bf16.mxu0 %v2880_v48 }
  0x40   :  { %1174 = vperm.xlu1 %2829, %v122_v54  }
  0x41   :  { %2582 = vmatmul.mubr.bf16.gmra.mxu0 %v2841_v38 }
  0x42   :  { %2585 = vmatprep.mubr.bf16.mxu0 %v2842_v40  ;;  %2694 = vmatpush3.bf16.msra.mxu0 %v2880_v48 }
  0x43   :  { %1179 = vperm.xlu0 %2828, %v123_v55   ;;  %v2881_v55 = vld [vmem:[%s4435_s7 + $0x20] sm:$0xff]  }
  0x44   :  { %1184 = vperm.xlu1 %2829, %v124_v57   ;;  %2695 = vmatprep.subr.bf16.mxu0 %v2881_v55 }
  0x46   :  { %2696 = vmatpush3.bf16.msra.mxu0 %v2881_v55 }
  0x47   :  { %1189 = vperm.xlu0 %2828, %v125_v59  }
  0x48   :  { %1194 = vperm.xlu1 %2829, %v126_v60  }
  0x49   :  { %2586 = vmatmul.mubr.bf16.gmra.mxu0 %v2843_v44 }
  0x4a   :  { %2589 = vmatprep.mubr.bf16.mxu0 %v2844_v46 }
  0x4b   :  { %1199 = vperm.xlu0 %2828, %v127_v61  }
  0x4c   :  { %1204 = vperm.xlu1 %2829, %v128_v63  }
  0x4f   :  { %1209 = vperm.xlu0 %2828, %v129_v18  }
  0x50   :  { %1214 = vperm.xlu1 %2829, %v130_v19  }
  0x51   :  { %2590 = vmatmul.mubr.bf16.gmra.mxu0 %v2845_v50  ;;  %v3344_v50 = vstv %s54_s9 }
  0x52   :  { %2593 = vmatprep.mubr.bf16.mxu0 %v2846_v52 }
  0x53   :  { %1219 = vperm.xlu0 %2828, %v131_v20  }
  0x54   :  { %1224 = vperm.xlu1 %2829, %v132_v22  }
  0x57   :  { %1229 = vperm.xlu0 %2828, %v133_v24  }
  0x58   :  { %1234 = vperm.xlu1 %2829, %v134_v25  }
  0x59   :  { %2594 = vmatmul.mubr.bf16.gmra.mxu0 %v2847_v56 }
  0x5a   :  { %2597 = vmatprep.mubr.bf16.mxu0 %v2848_v58 }
  0x61   :  { %2598 = vmatmul.mubr.bf16.gmra.mxu0 %v2849_v62 }
  0x62   :  { %2601 = vmatprep.mubr.bf16.mxu0 %v2850_v17 }
  0x69   :  { %2602 = vmatmul.mubr.bf16.gmra.mxu0 %v2851_v21  ;;  %v2882_v21 = vld [vmem:[%s4435_s7 + $0x18] sm:$0xff]  }
  0x6a   :  { %2605 = vmatprep.mubr.bf16.mxu0 %v2852_v23  ;;  %2697 = vmatprep.subr.bf16.mxu0 %v2882_v21 }
  0x6b   :  { %2698 = vmatpush3.bf16.msra.mxu0 %v2882_v21 }
  0x71   :  { %2606 = vmatmul.mubr.bf16.gmra.mxu0 %v2853_v26 }
  0xf9   :  { %v3294_v28 = vpop.f32.mrf.mxu0 }
  0xfa   :  { %v813_v57 = vmul.f32 %v3294_v28, %v3349_v51 }
  0xfb   :  { %v3296_v29 = vpop.f32.mrf.mxu0 }
  0xfc   :  { %v811_v61 = vmul.f32 %v3349_v51, %v3296_v29 }
  0xfd   :  { %v3298_v30 = vpop.f32.mrf.mxu0 }
  0xfe   :  { %v814_v58 = vmul.f32 %v3298_v30, %v3349_v51 }
  0xff   :  { %v3300_v31 = vpop.f32.mrf.mxu0 }
 0x100   :  { %v812_v62 = vmul.f32 %v3349_v51, %v3300_v31 }
 0x101   :  { %v3302_v32 = vpop.f32.mrf.mxu0 }
 0x103   :  { %v3304_v33 = vpop.f32.mrf.mxu0 }
 0x104   :  { %v815_v48 = vmul.f32 %v3349_v51, %v3304_v33 }
 0x105   :  { %v3306_v34 = vpop.f32.mrf.mxu0 }
 0x106   :  { %v644_v27 = vpack.c.bf16 %v3306_v34, %v3302_v32 }
 0x107   :  { %v3308_v35 = vpop.f32.mrf.mxu0 }
 0x109   :  { %v3310_v36 = vpop.f32.mrf.mxu0 }
 0x10a   :  { %v821_v7 = vmul.f32 %v3310_v36, %v3349_v51 }
 0x10b   :  { %v3312_v37 = vpop.f32.mrf.mxu0 }
 0x10d   :  { %v3314_v38 = vpop.f32.mrf.mxu0 }
 0x10e   :  { %v646_v53 = vpack.c.bf16 %v3314_v38, %v3310_v36  ;;  %v822_v2 = vmul.f32 %v3314_v38, %v3349_v51 }
 0x10f   :  { %v3316_v39 = vpop.f32.mrf.mxu0 }
 0x110   :  { %v645_v17 = vpack.c.bf16 %v3316_v39, %v3312_v37 }
 0x111   :  { %v3318_v40 = vpop.f32.mrf.mxu0 }
 0x113   :  { %v3320_v41 = vpop.f32.mrf.mxu0 }
 0x115   :  { %v3328_v44 = vpop.f32.mrf.mxu0 }
 0x116   :  { %v648_v45 = vpack.c.bf16 %v3328_v44, %v3318_v40 }
 0x117   :  { %v3335_v46 = vpop.f32.mrf.mxu0 }
 0x118   :  { %v647_v47 = vpack.c.bf16 %v3335_v46, %v3320_v41  ;;  %2609 = vmatprep.subr.bf16.mxu1 %v648_v45 }
 0x119   :  { %v3342_v49 = vpop.f32.mrf.mxu0  ;;  %2610 = vmatpush3.bf16.msra.mxu1 %v648_v45 }
 0x11a   :  { %2611 = vmatprep.subr.bf16.mxu1 %v647_v47  ;;  %v830_v54 = vmul.f32 %v3342_v49, %v3344_v50 }
 0x11b   :  { %v3351_v52 = vpop.f32.mrf.mxu0 }
 0x11c   :  { %v828_v59 = vmul.f32 %v3344_v50, %v3351_v52  ;;  %v846_v18 = vadd.f32 %v830_v54, %v813_v57  ;;  %v816_v54 = vmul.f32 %v3349_v51, %v3308_v35 }
 0x11d   :  { %v3360_v56 = vpop.f32.mrf.mxu0  ;;  %2612 = vmatpush3.bf16.msra.mxu1 %v647_v47 }
 0x11e   :  { %v831_v60 = vmul.f32 %v3360_v56, %v3344_v50  ;;  %2613 = vmatprep.subr.bf16.mxu1 %v646_v53  ;;  %v844_v23 = vadd.f32 %v828_v59, %v811_v61  ;;  %v642_v61 = vpack.c.bf16 %v3298_v30, %v3294_v28 }
 0x11f   :  { %v3374_v63 = vpop.f32.mrf.mxu0 }
 0x120   :  { %v847_v19 = vadd.f32 %v831_v60, %v814_v58  ;;  %v829_v20 = vmul.f32 %v3344_v50, %v3374_v63 }
 0x121   :  { %v3383_v22 = vpop.f32.mrf.mxu0  ;;  %2614 = vmatpush3.bf16.msra.mxu1 %v646_v53  ;;  %v643_v53 = vpack.c.bf16 %v3308_v35, %v3304_v33 }
 0x122   :  { %v845_v24 = vadd.f32 %v829_v20, %v812_v62  ;;  %2615 = vmatprep.subr.bf16.mxu1 %v645_v17  ;;  %v3385_v25 = vpack.c.bf16 %v847_v19, %v846_v18  ;;  %v641_v19 = vpack.c.bf16 %v3300_v31, %v3296_v29 }
 0x123   :  { %v3387_v26 = vpop.f32.mrf.mxu0 }
 0x124   :  { %v3391_v42 = vpack.c.bf16 %v845_v24, %v844_v23  ;;  %v832_v45 = vmul.f32 %v3344_v50, %v3387_v26  ;;  %v2855_v24 = vld [vmem:[%s4430_s2 + $0x8] sm:$0xff]  }
 0x125   :  { %v3393_v43 = vpop.f32.mrf.mxu0  ;;  %2616 = vmatpush3.bf16.msra.mxu1 %v645_v17 }
 0x126   :  { %2617 = vmatprep.subr.bf16.mxu1 %v644_v27  ;;  %v848_v58 = vadd.f32 %v832_v45, %v815_v48  ;;  %v2856_v45 = vld [vmem:[%s4430_s2 + $0x10] sm:$0xff]   ;;  %v825_v48 = vmul.f32 %v3318_v40, %v3349_v51 }
 0x127   :  { %v3397_v47 = vpop.f32.mrf.mxu0 }
 0x128   :  { %v833_v55 = vmul.f32 %v3344_v50, %v3397_v47 }
 0x129   :  { %v3407_v57 = vpop.f32.mrf.mxu0  ;;  %2618 = vmatpush3.bf16.msra.mxu1 %v644_v27 }
 0x12a   :  { %v849_v59 = vadd.f32 %v833_v55, %v816_v54  ;;  %2619 = vmatprep.subr.bf16.mxu1 %v643_v53  ;;  %v838_v3 = vmul.f32 %v3407_v57, %v3344_v50 }
 0x12b   :  { %v3409_v60 = vpop.f32.mrf.mxu0 }
 0x12c   :  { %v3413_v62 = vpack.c.bf16 %v849_v59, %v848_v58  ;;  %v823_v58 = vmul.f32 %v3349_v51, %v3320_v41  ;;  %v824_v59 = vmul.f32 %v3349_v51, %v3335_v46 }
 0x12d   :  { %v3415_v17 = vpop.f32.mrf.mxu0  ;;  %2620 = vmatpush3.bf16.msra.mxu1 %v643_v53  ;;  %v826_v53 = vmul.f32 %v3328_v44, %v3349_v51 }
 0x12e   :  { %2621 = vmatprep.subr.bf16.mxu1 %v642_v61 }
 0x12f   :  { %v3417_v18 = vpop.f32.mrf.mxu0 }
 0x131   :  { %v3421_v20 = vpop.f32.mrf.mxu0  ;;  %2622 = vmatpush3.bf16.msra.mxu1 %v642_v61 }
 0x132   :  { %2623 = vmatprep.subr.bf16.mxu1 %v641_v19  ;;  %v842_v23 = vmul.f32 %v3421_v20, %v3344_v50 }
 0x133   :  { %v3423_v21 = vpop.f32.mrf.mxu0 }
 0x134   :  { %v840_v54 = vmul.f32 %v3344_v50, %v3423_v21  ;;  %v858_v16 = vadd.f32 %v842_v23, %v825_v48  ;;  %v837_v23 = vmul.f32 %v3344_v50, %v3417_v18 }
 0x135   :  { %v3430_v27 = vpop.f32.mrf.mxu0  ;;  %2624 = vmatpush3.bf16.msra.mxu1 %v641_v19  ;;  %v839_v19 = vmul.f32 %v3415_v17, %v3344_v50 }
 0x136   :  { %v843_v55 = vmul.f32 %v3430_v27, %v3344_v50  ;;  %v856_v4 = vadd.f32 %v840_v54, %v823_v58  ;;  %v817_v54 = vmul.f32 %v3302_v32, %v3349_v51 }
 0x137   :  { %v3447_v61 = vpop.f32.mrf.mxu0  ;;  %v855_v8 = vadd.f32 %v839_v19, %v822_v2  ;;  %v836_v2 = vmul.f32 %v3344_v50, %v3409_v60 }
 0x138   :  { %v859_v0 = vadd.f32 %v843_v55, %v826_v53  ;;  %v841_v1 = vmul.f32 %v3344_v50, %v3447_v61  ;;  %2626 = vmatmul.mubr.bf16.vlgmr.msra.gmra.mxu1 %v2855_v24  ;;  %v2857_v24 = vld [vmem:[%s4430_s2 + $0x18] sm:$0xff]   ;;  %v818_v53 = vmul.f32 %v3306_v34, %v3349_v51 }
 0x139   :  { %2629 = vmatprep.mubr.bf16.mxu1 %v2856_v45  ;;  %v2858_v45 = vld [vmem:[%s4430_s2 + $0x20] sm:$0xff]  }
 0x13a   :  { %v857_v5 = vadd.f32 %v841_v1, %v824_v59  ;;  %v867_v6 = vpack.c.bf16 %v859_v0, %v858_v16  ;;  %v820_v0 = vmul.f32 %v3349_v51, %v3316_v39  ;;  %v854_v1 = vadd.f32 %v838_v3, %v821_v7  ;;  %v2859_v59 = vld [vmem:[%s4430_s2 + $0x28] sm:$0xff]  }
 0x13b   :  { %v834_v3 = vmul.f32 %v3383_v22, %v3344_v50 }
 0x13c   :  { %2641 = vmatprep.subr.bf16.mxu1 %v867_v6  ;;  %v866_v48 = vpack.c.bf16 %v857_v5, %v856_v4  ;;  %v819_v4 = vmul.f32 %v3349_v51, %v3312_v37  ;;  %v835_v5 = vmul.f32 %v3393_v43, %v3344_v50  ;;  %v853_v16 = vadd.f32 %v837_v23, %v820_v0  ;;  %v3510_v0 = vld [vmem:[%s4430_s2 + $0x10] sm:$0xff]  }
 0x13d   :  { %2642 = vmatpush3.bf16.msra.mxu1 %v867_v6  ;;  %v865_v6 = vpack.c.bf16 %v855_v8, %v854_v1  ;;  %v2860_v8 = vld [vmem:[%s4430_s2 + $0x30] sm:$0xff]   ;;  %v850_v19 = vadd.f32 %v834_v3, %v817_v54  ;;  %4500 = vst [vmem:[#allocation27_spill] sm:$0xff] %v3510_v0  ;;  %v3571_v3 = vld [vmem:[%s4430_s2 + $0x58] sm:$0xff]   ;;  %v3579_v54 = vld [vmem:[%s4430_s2 + $0x60] sm:$0xff]  }
 0x13e   :  { %2643 = vmatprep.subr.bf16.mxu1 %v866_v48  ;;  %v852_v7 = vadd.f32 %v836_v2, %v819_v4  ;;  %v851_v55 = vadd.f32 %v835_v5, %v818_v53  ;;  %v3534_v1 = vld [vmem:[%s4430_s2 + $0x30] sm:$0xff]   ;;  %v3541_v2 = vld [vmem:[%s4430_s2 + $0x38] sm:$0xff]   ;;  %v3546_v4 = vld [vmem:[%s4430_s2 + $0x40] sm:$0xff]   ;;  %4509 = vst [vmem:[#allocation36_spill] sm:$0xff] %v3571_v3 }
 0x13f   :  { %4504 = vst [vmem:[#allocation31_spill] sm:$0xff] %v3534_v1  ;;  %4505 = vst [vmem:[#allocation32_spill] sm:$0xff] %v3541_v2  ;;  %v3553_v5 = vld [vmem:[%s4430_s2 + $0x48] sm:$0xff]  }
 0x140   :  { %2630 = vmatmul.mubr.bf16.gmra.mxu1 %v2857_v24  ;;  %v864_v58 = vpack.c.bf16 %v853_v16, %v852_v7  ;;  %v863_v23 = vpack.c.bf16 %v851_v55, %v850_v19  ;;  %v3493_v24 = vld [vmem:[%s4430_s2] sm:$0xff]   ;;  %4506 = vst [vmem:[#allocation33_spill] sm:$0xff] %v3546_v4  ;;  %4507 = vst [vmem:[#allocation34_spill] sm:$0xff] %v3553_v5  ;;  %v2883_v16 = vld [vmem:[%s4435_s7 + $0x10] sm:$0xff]   ;;  %v3603_v19 = vpop.permute.xlu1 %535 }
 0x141   :  { %2644 = vmatpush3.bf16.msra.mxu1 %v866_v48  ;;  %2633 = vmatprep.mubr.bf16.mxu1 %v2858_v45  ;;  %v2861_v48 = vld [vmem:[%s4430_s2 + $0x38] sm:$0xff]   ;;  %4498 = vst [vmem:[#allocation25_spill] sm:$0xff] %v3493_v24  ;;  %v3504_v45 = vld [vmem:[%s4430_s2 + $0x8] sm:$0xff]   ;;  %v2885_v7 = vld [vmem:[%s4435_s7] sm:$0xff]   ;;  %v605_v10 = vmul.f32 %v3294_v28, %v3603_v19 }
 0x142   :  { %2645 = vmatprep.subr.bf16.mxu1 %v865_v6  ;;  %4499 = vst [vmem:[#allocation26_spill] sm:$0xff] %v3504_v45  ;;  %2699 = vmatprep.subr.bf16.mxu0 %v2883_v16  ;;  %v2884_v53 = vld [vmem:[%s4435_s7 + $0x8] sm:$0xff]   ;;  %4510 = vst [vmem:[#allocation37_spill] sm:$0xff] %v3579_v54 }
 0x143   :  { %2700 = vmatpush3.bf16.msra.mxu0 %v2883_v16  ;;  %v3586_v55 = vld [vmem:[%s4430_s2 + $0x68] sm:$0xff]   ;;  %4515 = vst [vmem:[#allocation42_spill] sm:$0xff] %v3603_v19 }
 0x144   :  { %2701 = vmatprep.subr.bf16.mxu0 %v2884_v53  ;;  %4511 = vst [vmem:[#allocation38_spill] sm:$0xff] %v3586_v55 }
 0x145   :  { %2646 = vmatpush3.bf16.msra.mxu1 %v865_v6  ;;  %v3561_v6 = vld [vmem:[%s4430_s2 + $0x50] sm:$0xff]  }
 0x146   :  { %2647 = vmatprep.subr.bf16.mxu1 %v864_v58  ;;  %4508 = vst [vmem:[#allocation35_spill] sm:$0xff] %v3561_v6 }
 0x147   :  { %2702 = vmatpush3.bf16.msra.mxu0 %v2884_v53 }
 0x148   :  { %2634 = vmatmul.mubr.bf16.gmra.mxu1 %v2859_v59  ;;  %2703 = vmatprep.subr.bf16.mxu0 %v2885_v7  ;;  %v3598_v59 = vld [vmem:[%s4430_s2 + $0x78] sm:$0xff]  }
 0x149   :  { %2648 = vmatpush3.bf16.msra.mxu1 %v864_v58  ;;  %2637 = vmatprep.mubr.bf16.mxu1 %v2860_v8  ;;  %v3591_v58 = vld [vmem:[%s4430_s2 + $0x70] sm:$0xff]   ;;  %4513 = vst [vmem:[#allocation40_spill] sm:$0xff] %v3598_v59  ;;  %v3601_v8 = vpop.permute.xlu0 %525 }
 0x14a   :  { %2649 = vmatprep.subr.bf16.mxu1 %v863_v23  ;;  %4512 = vst [vmem:[#allocation39_spill] sm:$0xff] %v3591_v58  ;;  %4514 = vst [vmem:[#allocation41_spill] sm:$0xff] %v3601_v8  ;;  %v603_v12 = vmul.f32 %v3601_v8, %v3296_v29 }
 0x14b   :  { %2704 = vmatpush3.bf16.msra.mxu0 %v2885_v7 }
 0x14d   :  { %2650 = vmatpush3.bf16.msra.mxu1 %v863_v23  ;;  %v3605_v23 = vpop.permute.xlu0 %530 }
 0x14e   :  { %2651 = vmatprep.subr.bf16.mxu1 %v3413_v62  ;;  %4516 = vst [vmem:[#allocation43_spill] sm:$0xff] %v3605_v23 }
 0x150   :  { %2638 = vmatmul.mubr.bf16.gmra.mxu1 %v2861_v48  ;;  %v3607_v48 = vpop.permute.xlu1 %540 }
 0x151   :  { %2652 = vmatpush3.bf16.msra.mxu1 %v3413_v62  ;;  %2657 = vmatprep.mubr.bf16.mxu1 %v3493_v24  ;;  %v3522_v62 = vld [vmem:[%s4430_s2 + $0x20] sm:$0xff]   ;;  %4517 = vst [vmem:[#allocation44_spill] sm:$0xff] %v3607_v48  ;;  %v3609_v16 = vpop.permute.xlu0 %545  ;;  %v606_v13 = vmul.f32 %v3298_v30, %v3607_v48 }
 0x152   :  { %2653 = vmatprep.subr.bf16.mxu1 %v3385_v25  ;;  %4502 = vst [vmem:[#allocation29_spill] sm:$0xff] %v3522_v62  ;;  %4518 = vst [vmem:[#allocation45_spill] sm:$0xff] %v3609_v16 }
 0x153   :  { %v3642_v29 = vadd.f32 %v3622_v11, %v606_v13 }
 0x154   :  { %v3611_v53 = vpop.permute.xlu1 %550 }
 0x155   :  { %2654 = vmatpush3.bf16.msra.mxu1 %v3385_v25  ;;  %v3517_v25 = vld [vmem:[%s4430_s2 + $0x18] sm:$0xff]   ;;  %4519 = vst [vmem:[#allocation46_spill] sm:$0xff] %v3611_v53  ;;  %v3613_v7 = vpop.permute.xlu0 %555 }
 0x156   :  { %2655 = vmatprep.subr.bf16.mxu1 %v3391_v42  ;;  %4501 = vst [vmem:[#allocation28_spill] sm:$0xff] %v3517_v25  ;;  %4520 = vst [vmem:[#allocation47_spill] sm:$0xff] %v3613_v7  ;;  %v609_v30 = vmul.f32 %v3302_v32, %v3613_v7 }
 0x158   :  { %v3615_v9 = vpop.permute.xlu1 %560 }
 0x159   :  { %2656 = vmatpush3.bf16.msra.mxu1 %v3391_v42  ;;  %v3529_v42 = vld [vmem:[%s4430_s2 + $0x28] sm:$0xff]   ;;  %4521 = vst [vmem:[#allocation48_spill] sm:$0xff] %v3615_v9  ;;  %v3628_v14 = vpop.permute.xlu0 %565  ;;  %v610_v13 = vmul.f32 %v3306_v34, %v3615_v9 }
 0x15a   :  { %4503 = vst [vmem:[#allocation30_spill] sm:$0xff] %v3529_v42  ;;  %4522 = vst [vmem:[#allocation49_spill] sm:$0xff] %v3628_v14 }
 0x15c   :  { %2658 = vmatmul.mubr.bf16.vlgmr.msra.gmra.mxu1 %v3504_v45  ;;  %v3635_v28 = vpop.permute.xlu1 %570 }
 0x15d   :  { %2661 = vmatprep.mubr.bf16.mxu1 %v3510_v0  ;;  %4523 = vst [vmem:[#allocation50_spill] sm:$0xff] %v3635_v28  ;;  %v3646_v8 = vpop.permute.xlu0 %575 }
 0x15e   :  { %4524 = vst [vmem:[#allocation51_spill] sm:$0xff] %v3646_v8 }
 0x160   :  { %v3658_v7 = vpop.permute.xlu1 %580 }
 0x161   :  { %4525 = vst [vmem:[#allocation52_spill] sm:$0xff] %v3658_v7 }
 0x164   :  { %2662 = vmatmul.mubr.bf16.gmra.mxu1 %v3517_v25 }
 0x165   :  { %2665 = vmatprep.mubr.bf16.mxu1 %v3522_v62 }
 0x16c   :  { %2666 = vmatmul.mubr.bf16.gmra.mxu1 %v3529_v42 }
 0x16d   :  { %2669 = vmatprep.mubr.bf16.mxu1 %v3534_v1 }
 0x174   :  { %2670 = vmatmul.mubr.bf16.gmra.mxu1 %v3541_v2  ;;  %v3665_v2 = vpop.permute.xlu0 %585 }
 0x175   :  { %2673 = vmatprep.mubr.bf16.mxu1 %v3546_v4  ;;  %4526 = vst [vmem:[#allocation53_spill] sm:$0xff] %v3665_v2 }
 0x17c   :  { %2674 = vmatmul.mubr.bf16.gmra.mxu1 %v3553_v5 }
 0x17d   :  { %2677 = vmatprep.mubr.bf16.mxu1 %v3561_v6 }
 0x184   :  { %2678 = vmatmul.mubr.bf16.gmra.mxu1 %v3571_v3 }
 0x185   :  { %2681 = vmatprep.mubr.bf16.mxu1 %v3579_v54  ;;  %v3639_v54 = vadd.f32 %v3622_v11, %v603_v12  ;;  %v607_v12 = vmul.f32 %v3609_v16, %v3304_v33 }
 0x18c   :  { %2682 = vmatmul.mubr.bf16.gmra.mxu1 %v3586_v55 }
 0x18d   :  { %2685 = vmatprep.mubr.bf16.mxu1 %v3591_v58  ;;  %v3633_v58 = vadd.f32 %v3622_v11, %v605_v10 }
 0x194   :  { %2686 = vmatmul.mubr.bf16.gmra.mxu1 %v3598_v59  ;;  %v604_v59 = vmul.f32 %v3605_v23, %v3300_v31 }
 0x196   :  { %v3651_v23 = vadd.f32 %v3622_v11, %v604_v59  ;;  %v608_v59 = vmul.f32 %v3611_v53, %v3308_v35 }
 0x1f8   :  { %v2627_v15 = vpop.f32.mrf.mxu1 }
 0x1f9   :  { %v740_v55 = vadd.f32 %v2627_v15, %v3633_v58 }
 0x1fa   :  { %v731_v19 = vpop.f32.mrf.mxu1 }
 0x1fb   :  { %v732_v10 = vadd.f32 %v731_v19, %v3639_v54  ;;  %v796_v3 = vmax.f32 %v740_v55, 0.0  ;;  %v3661_v19 = vadd.f32 %v3622_v11, %v609_v30  ;;  %v613_v30 = vmul.f32 %v3310_v36, %v3646_v8 }
 0x1fc   :  { %v2628_v48 = vpop.f32.mrf.mxu1 }
 0x1fd   :  { %v743_v31 = vadd.f32 %v2628_v48, %v3642_v29  ;;  %v794_v5 = vmax.f32 %v732_v10, 0.0  ;;  %v3683_v10 = vpop.permute.xlu1 %590 }
 0x1fe   :  { %v734_v15 = vpop.f32.mrf.mxu1  ;;  %4527 = vst [vmem:[#allocation54_spill] sm:$0xff] %v3683_v10 }
 0x1ff   :  { %v797_v6 = vmax.f32 %v743_v31, 0.0  ;;  %v735_v32 = vadd.f32 %v734_v15, %v3651_v23  ;;  %v3669_v31 = vadd.f32 %v3622_v11, %v607_v12  ;;  %v3672_v15 = vadd.f32 %v3622_v11, %v610_v13 }
 0x200   :  { %v2631_v48 = vpop.f32.mrf.mxu1  ;;  %v614_v13 = vmul.f32 %v3314_v38, %v3658_v7 }
 0x201   :  { %v1350_v4 = vpack.c.bf16 %v797_v6, %v796_v3  ;;  %v795_v33 = vmax.f32 %v735_v32, 0.0  ;;  %v756_v55 = vadd.f32 %v2631_v48, %v3661_v19  ;;  %v3679_v3 = vadd.f32 %v3622_v11, %v608_v59 }
 0x202   :  { %v747_v16 = vpop.f32.mrf.mxu1  ;;  %v612_v59 = vmul.f32 %v3635_v28, %v3316_v39 }
 0x203   :  { %v1349_v34 = vpack.c.bf16 %v795_v33, %v794_v5  ;;  %v748_v35 = vadd.f32 %v747_v16, %v3669_v31  ;;  %v611_v5 = vmul.f32 %v3628_v14, %v3312_v37  ;;  %v800_v36 = vmax.f32 %v756_v55, 0.0  ;;  %v3693_v33 = vpop.permute.xlu0 %595 }
 0x204   :  { %v2632_v9 = vpop.f32.mrf.mxu1  ;;  %4528 = vst [vmem:[#allocation55_spill] sm:$0xff] %v3693_v33 }
 0x205   :  { %v759_v6 = vadd.f32 %v2632_v9, %v3672_v15  ;;  %2705 = vmatprep.mubr.bf16.mxu0 %v1349_v34  ;;  %v3689_v9 = vadd.f32 %v3622_v11, %v613_v30  ;;  %v798_v37 = vmax.f32 %v748_v35, 0.0  ;;  %v3697_v55 = vadd.f32 %v3622_v11, %v611_v5 }
 0x206   :  { %v750_v12 = vpop.f32.mrf.mxu1  ;;  %2706 = vmatmul.mubr.bf16.vlgmr.msra.gmra.mxu0 %v1350_v4  ;;  %v617_v30 = vmul.f32 %v3318_v40, %v3693_v33  ;;  %v615_v5 = vmul.f32 %v3665_v2, %v3320_v41 }
 0x207   :  { %v801_v32 = vmax.f32 %v759_v6, 0.0  ;;  %v751_v16 = vadd.f32 %v750_v12, %v3679_v3  ;;  %v3700_v6 = vadd.f32 %v3622_v11, %v614_v13  ;;  %v3704_v12 = vpop.permute.xlu1 %600  ;;  %v3721_v41 = vpop.permute.xlu0 %1159 }
 0x208   :  { %v2635_v48 = vpop.f32.mrf.mxu1  ;;  %4529 = vst [vmem:[#allocation56_spill] sm:$0xff] %v3704_v12  ;;  %v618_v13 = vmul.f32 %v3328_v44, %v3704_v12  ;;  %4531 = vst [vmem:[#allocation58_spill] sm:$0xff] %v3721_v41 }
 0x209   :  { %v1352_v34 = vpack.c.bf16 %v801_v32, %v800_v36  ;;  %v799_v14 = vmax.f32 %v751_v16, 0.0  ;;  %v772_v38 = vadd.f32 %v2635_v48, %v3689_v9 }
 0x20a   :  { %v763_v4 = vpop.f32.mrf.mxu1 }
 0x20b   :  { %v1351_v8 = vpack.c.bf16 %v799_v14, %v798_v37  ;;  %v764_v35 = vadd.f32 %v763_v4, %v3697_v55  ;;  %v3709_v14 = vadd.f32 %v3622_v11, %v612_v59  ;;  %v804_v40 = vmax.f32 %v772_v38, 0.0 }
 0x20c   :  { %v2636_v39 = vpop.f32.mrf.mxu1  ;;  %v3717_v37 = vadd.f32 %v3622_v11, %v617_v30  ;;  %v3725_v38 = vadd.f32 %v3622_v11, %v615_v5  ;;  %v3730_v30 = vpop.permute.xlu1 %1164 }
 0x20d   :  { %v775_v36 = vadd.f32 %v2636_v39, %v3700_v6  ;;  %2709 = vmatprep.mubr.bf16.mxu0 %v1351_v8  ;;  %v616_v8 = vmul.f32 %v3683_v10, %v3335_v46  ;;  %v802_v59 = vmax.f32 %v764_v35, 0.0 }
 0x20e   :  { %v766_v32 = vpop.f32.mrf.mxu1  ;;  %2710 = vmatmul.mubr.bf16.gmra.mxu0 %v1352_v34  ;;  %4530 = vst [vmem:[#allocation57_spill] sm:$0xff] %v3717_v37  ;;  %4532 = vst [vmem:[#allocation59_spill] sm:$0xff] %v3725_v38 }
 0x20f   :  { %v805_v16 = vmax.f32 %v775_v36, 0.0  ;;  %v767_v48 = vadd.f32 %v766_v32, %v3709_v14  ;;  %v3728_v36 = vadd.f32 %v3622_v11, %v618_v13 }
 0x210   :  { %v2639_v4 = vpop.f32.mrf.mxu1  ;;  %v3740_v12 = vpop.permute.xlu1 %1174 }
 0x211   :  { %v1354_v39 = vpack.c.bf16 %v805_v16, %v804_v40  ;;  %v803_v33 = vmax.f32 %v767_v48, 0.0  ;;  %v788_v44 = vadd.f32 %v2639_v4, %v3717_v37  ;;  %4533 = vst [vmem:[#allocation60_spill] sm:$0xff] %v3728_v36  ;;  %v3735_v40 = vadd.f32 %v3622_v11, %v616_v8  ;;  %v3738_v4 = vpop.permute.xlu0 %1169 }
 0x212   :  { %v779_v34 = vpop.f32.mrf.mxu1  ;;  %4535 = vst [vmem:[#allocation62_spill] sm:$0xff] %v3738_v4  ;;  %v1240_v37 = vmul.f32 %v3360_v56, %v3740_v12 }
 0x213   :  { %v1353_v2 = vpack.c.bf16 %v803_v33, %v802_v59  ;;  %v780_v46 = vadd.f32 %v779_v34, %v3725_v38  ;;  %4534 = vst [vmem:[#allocation61_spill] sm:$0xff] %v3735_v40  ;;  %v808_v16 = vmax.f32 %v788_v44, 0.0  ;;  %v1237_v38 = vmul.f32 %v3721_v41, %v3351_v52 }
 0x214   :  { %v2640_v32 = vpop.f32.mrf.mxu1 }
 0x215   :  { %v791_v35 = vadd.f32 %v2640_v32, %v3728_v36  ;;  %2713 = vmatprep.mubr.bf16.mxu0 %v1353_v2  ;;  %v806_v13 = vmax.f32 %v780_v46, 0.0  ;;  %v3742_v2 = vpop.permute.xlu0 %1179  ;;  %v3744_v32 = vpop.permute.xlu1 %1184 }
 0x216   :  { %v782_v33 = vpop.f32.mrf.mxu1  ;;  %2714 = vmatmul.mubr.bf16.gmra.mxu0 %v1354_v39 }
 0x217   :  { %v809_v48 = vmax.f32 %v791_v35, 0.0  ;;  %v783_v5 = vadd.f32 %v782_v33, %v3735_v40  ;;  %v1239_v40 = vmul.f32 %v3342_v49, %v3738_v4 }
 0x219   :  { %v1356_v59 = vpack.c.bf16 %v809_v48, %v808_v16  ;;  %v807_v10 = vmax.f32 %v783_v5, 0.0  ;;  %v3746_v35 = vpop.permute.xlu0 %1189  ;;  %v3748_v7 = vpop.permute.xlu1 %1194 }
 0x21a   :  { %v1244_v56 = vmul.f32 %v3393_v43, %v3748_v7 }
 0x21b   :  { %v1355_v34 = vpack.c.bf16 %v807_v10, %v806_v13 }
 0x21c   :  { %v2659_v28 = vpop.f32.mrf.mxu1 }
 0x21d   :  { %2717 = vmatprep.mubr.bf16.mxu0 %v1355_v34  ;;  %v3750_v48 = vpop.permute.xlu0 %1199  ;;  %v3754_v5 = vpop.permute.xlu1 %1204  ;;  %v1127_v49 = vadd.f32 %v2659_v28, %v3633_v58 }
 0x21e   :  { %v998_v8 = vpop.f32.mrf.mxu1  ;;  %2718 = vmatmul.mubr.bf16.gmra.mxu0 %v1356_v59  ;;  %4536 = vst [vmem:[#allocation63_spill] sm:$0xff] %v3754_v5  ;;  %v3809_v58 = vmul.f32 %v3750_v48, %v3409_v60  ;;  %v3817_v43 = vmul.f32 %v3754_v5, %v3417_v18 }
 0x21f   :  { %v1125_v4 = vadd.f32 %v998_v8, %v3639_v54 }
 0x220   :  { %v2660_v39 = vpop.f32.mrf.mxu1 }
 0x221   :  { %v3760_v34 = vpop.permute.xlu0 %1209  ;;  %v3764_v1 = vpop.permute.xlu1 %1214  ;;  %v1128_v52 = vadd.f32 %v2660_v39, %v3642_v29  ;;  %v1141_v8 = vmax.f32 %v1125_v4, 0.0 }
 0x222   :  { %v1001_v44 = vpop.f32.mrf.mxu1  ;;  %v3813_v54 = vmul.f32 %v3415_v17, %v3764_v1 }
 0x223   :  { %v1144_v18 = vmax.f32 %v1128_v52, 0.0 }
 0x224   :  { %v2663_v33 = vpop.f32.mrf.mxu1 }
 0x225   :  { %v3770_v25 = vpop.permute.xlu0 %1219  ;;  %v3774_v45 = vpop.permute.xlu1 %1224  ;;  %v1131_v39 = vadd.f32 %v2663_v33, %v3661_v19 }
 0x226   :  { %v1014_v46 = vpop.f32.mrf.mxu1  ;;  %v3828_v60 = vmul.f32 %v3770_v25, %v3423_v21  ;;  %v3839_v21 = vmul.f32 %v3774_v45, %v3447_v61 }
 0x227   :  { %v1147_v61 = vmax.f32 %v1131_v39, 0.0 }
 0x228   :  { %v2664_v16 = vpop.f32.mrf.mxu1 }
 0x229   :  { %v3819_v28 = vpop.permute.xlu1 %1234  ;;  %v1132_v4 = vadd.f32 %v2664_v16, %v3672_v15  ;;  %v1307_v39 = vmul.f32 %v1147_v61, %v3349_v51 }
 0x22a   :  { %v3752_v10 = vpop.f32.mrf.mxu1 }
 0x22c   :  { %v3756_v13 = vpop.f32.mrf.mxu1 }
 0x22e   :  { %v3758_v59 = vpop.f32.mrf.mxu1 }
 0x230   :  { %v3762_v53 = vpop.f32.mrf.mxu1 }
 0x232   :  { %v3766_v42 = vpop.f32.mrf.mxu1 }
 0x233   :  { %4537 = vst [vmem:[#allocation64_spill] sm:$0xff] %v3766_v42  ;;  %v3792_v42 = vpop.permute.xlu0 %1229 }
 0x234   :  { %v3768_v62 = vpop.f32.mrf.mxu1  ;;  %4541 = vst [vmem:[#allocation68_spill] sm:$0xff] %v3792_v42 }
 0x235   :  { %4538 = vst [vmem:[#allocation65_spill] sm:$0xff] %v3768_v62  ;;  %v1238_v62 = vmul.f32 %v3730_v30, %v3374_v63  ;;  %v3801_v63 = vmul.f32 %v3744_v32, %v3397_v47  ;;  %v1126_v47 = vadd.f32 %v1001_v44, %v3651_v23  ;;  %v3834_v23 = vmul.f32 %v3430_v27, %v3819_v28 }
 0x236   :  { %v3772_v0 = vpop.f32.mrf.mxu1 }
 0x237   :  { %4539 = vst [vmem:[#allocation66_spill] sm:$0xff] %v3772_v0  ;;  %v1243_v0 = vmul.f32 %v3383_v22, %v3746_v35  ;;  %v3805_v22 = vmul.f32 %v3407_v57, %v3760_v34  ;;  %v3824_v57 = vmul.f32 %v3421_v20, %v3792_v42 }
 0x238   :  { %v3776_v24 = vpop.f32.mrf.mxu1 }
 0x239   :  { %4540 = vst [vmem:[#allocation67_spill] sm:$0xff] %v3776_v24  ;;  %v1241_v24 = vmul.f32 %v3742_v2, %v3387_v26 }
 0x23a   :  { %v3780_v36 = vpop.f32.mrf.mxu1 }
 0x23c   :  { %v2675_v41 = vpop.f32.mrf.mxu1 }
 0x23d   :  { %v1255_v26 = vadd.f32 %v2675_v41, %v1239_v40  ;;  %v1143_v40 = vmax.f32 %v1127_v49, 0.0 }
 0x23e   :  { %v1062_v29 = vpop.f32.mrf.mxu1 }
 0x23f   :  { %v1271_v17 = vadd.f32 %v3622_v11, %v1255_v26  ;;  %v1253_v41 = vadd.f32 %v1237_v38, %v1062_v29  ;;  %v1142_v26 = vmax.f32 %v1126_v47, 0.0  ;;  %v1129_v38 = vadd.f32 %v1014_v46, %v3669_v31 }
 0x240   :  { %v2676_v5 = vpop.f32.mrf.mxu1  ;;  %v1303_v29 = vmul.f32 %v1143_v40, %v3349_v51 }
 0x241   :  { %v1287_v44 = vmax.f32 %v1271_v17, 0.0  ;;  %v1269_v20 = vadd.f32 %v3622_v11, %v1253_v41  ;;  %v1256_v42 = vadd.f32 %v2676_v5, %v1240_v37  ;;  %v1301_v37 = vmul.f32 %v1141_v8, %v3349_v51 }
 0x242   :  { %v1065_v49 = vpop.f32.mrf.mxu1  ;;  %v1304_v5 = vmul.f32 %v1144_v18, %v3349_v51  ;;  %v1302_v16 = vmul.f32 %v1142_v26, %v3349_v51  ;;  %v1145_v41 = vmax.f32 %v1129_v38, 0.0 }
 0x243   :  { %v1319_v19 = vmul.f32 %v1287_v44, %v3344_v50  ;;  %v1285_v33 = vmax.f32 %v1269_v20, 0.0  ;;  %v1272_v27 = vadd.f32 %v3622_v11, %v1256_v42  ;;  %v1254_v52 = vadd.f32 %v1238_v62, %v1065_v49 }
 0x244   :  { %v2679_v17 = vpop.f32.mrf.mxu1  ;;  %v1148_v44 = vmax.f32 %v1132_v4, 0.0  ;;  %v1130_v49 = vadd.f32 %v3752_v10, %v3679_v3 }
 0x245   :  { %v1317_v47 = vmul.f32 %v1285_v33, %v3344_v50  ;;  %v1288_v31 = vmax.f32 %v1272_v27, 0.0  ;;  %v1270_v15 = vadd.f32 %v3622_v11, %v1254_v52  ;;  %v1259_v46 = vadd.f32 %v2679_v17, %v1243_v0 }
 0x246   :  { %v1078_v42 = vpop.f32.mrf.mxu1  ;;  %v1335_v62 = vadd.f32 %v1319_v19, %v1303_v29  ;;  %v1135_v0 = vadd.f32 %v3756_v13, %v3689_v9  ;;  %v1305_v52 = vmul.f32 %v1145_v41, %v3349_v51  ;;  %v1133_v29 = vadd.f32 %v3758_v59, %v3697_v55 }
 0x247   :  { %v1320_v40 = vmul.f32 %v1288_v31, %v3344_v50  ;;  %v1286_v20 = vmax.f32 %v1270_v15, 0.0  ;;  %v1275_v8 = vadd.f32 %v3622_v11, %v1259_v46  ;;  %v1257_v18 = vadd.f32 %v1241_v24, %v1078_v42 }
 0x248   :  { %v2680_v33 = vpop.f32.mrf.mxu1  ;;  %v1333_v26 = vadd.f32 %v1317_v47, %v1301_v37  ;;  %v1308_v24 = vmul.f32 %v1148_v44, %v3349_v51  ;;  %v1146_v17 = vmax.f32 %v1130_v49, 0.0  ;;  %v1151_v47 = vmax.f32 %v1135_v0, 0.0 }
 0x249   :  { %v1318_v38 = vmul.f32 %v1286_v20, %v3344_v50  ;;  %v1291_v4 = vmax.f32 %v1275_v8, 0.0  ;;  %v1273_v19 = vadd.f32 %v3622_v11, %v1257_v18  ;;  %v1260_v27 = vadd.f32 %v2680_v33, %v1244_v56 }
 0x24a   :  { %v1081_v61 = vpop.f32.mrf.mxu1  ;;  %v1336_v3 = vadd.f32 %v1320_v40, %v1304_v5  ;;  %v1149_v59 = vmax.f32 %v1133_v29, 0.0  ;;  %v1136_v5 = vadd.f32 %v3762_v53, %v3700_v6  ;;  %v1306_v18 = vmul.f32 %v1146_v17, %v3349_v51  ;;  %v4546_v17 = vld [vmem:[#allocation66_spill] sm:$0xff] }
 0x24b   :  { %v1323_v10 = vmul.f32 %v1291_v4, %v3344_v50  ;;  %v1289_v9 = vmax.f32 %v1273_v19, 0.0  ;;  %v1276_v13 = vadd.f32 %v3622_v11, %v1260_v27  ;;  %v1258_v37 = vadd.f32 %v3801_v63, %v1081_v61  ;;  %v4543_v19 = vld [vmem:[#allocation57_spill] sm:$0xff] }
 0x24c   :  { %v2683_v31 = vpop.f32.mrf.mxu1  ;;  %v1334_v56 = vadd.f32 %v1318_v38, %v1302_v16  ;;  %v1358_v15 = vpack.c.bf16 %v1336_v3, %v1335_v62  ;;  %v1311_v49 = vmul.f32 %v1151_v47, %v3349_v51  ;;  %v1152_v4 = vmax.f32 %v1136_v5, 0.0  ;;  %v4544_v27 = vld [vmem:[#allocation65_spill] sm:$0xff] }
 0x24d   :  { %v1321_v46 = vmul.f32 %v1289_v9, %v3344_v50  ;;  %v1292_v41 = vmax.f32 %v1276_v13, 0.0  ;;  %v1274_v44 = vadd.f32 %v3622_v11, %v1258_v37  ;;  %v1263_v55 = vadd.f32 %v2683_v31, %v3805_v22  ;;  %v4542_v22 = vld [vmem:[#allocation64_spill] sm:$0xff]  ;;  %v4545_v37 = vld [vmem:[#allocation59_spill] sm:$0xff] }
 0x24e   :  { %v1094_v42 = vpop.f32.mrf.mxu1  ;;  %v1357_v40 = vpack.c.bf16 %v1334_v56, %v1333_v26  ;;  %v1339_v20 = vadd.f32 %v1323_v10, %v1307_v39  ;;  %v1134_v0 = vadd.f32 %v4542_v22, %v3709_v14  ;;  %v1139_v29 = vadd.f32 %v4544_v27, %v4543_v19  ;;  %v4549_v22 = vld [vmem:[#allocation61_spill] sm:$0xff] }
 0x24f   :  { %v1324_v63 = vmul.f32 %v1292_v41, %v3344_v50  ;;  %v1290_v8 = vmax.f32 %v1274_v44, 0.0  ;;  %v1279_v16 = vadd.f32 %v3622_v11, %v1263_v55  ;;  %v1261_v62 = vadd.f32 %v3809_v58, %v1094_v42  ;;  %v4547_v55 = vld [vmem:[#allocation60_spill] sm:$0xff] }
 0x250   :  { %2721 = vmatprep.mubr.bf16.mxu0 %v1357_v40  ;;  %v2684_v33 = vpop.f32.mrf.mxu1  ;;  %v1337_v53 = vadd.f32 %v1321_v46, %v1305_v52  ;;  %v1309_v58 = vmul.f32 %v1149_v59, %v3349_v51  ;;  %v1150_v13 = vmax.f32 %v1134_v0, 0.0  ;;  %v1155_v44 = vmax.f32 %v1139_v29, 0.0  ;;  %v4548_v59 = vld [vmem:[#allocation67_spill] sm:$0xff] }
 0x251   :  { %v1322_v6 = vmul.f32 %v1290_v8, %v3344_v50  ;;  %v1295_v39 = vmax.f32 %v1279_v16, 0.0  ;;  %v1277_v26 = vadd.f32 %v3622_v11, %v1261_v62  ;;  %v1264_v38 = vadd.f32 %v2684_v33, %v3813_v54  ;;  %2722 = vmatmul.mubr.bf16.gmra.mxu0 %v1358_v15 }
 0x252   :  { %v1097_v61 = vpop.f32.mrf.mxu1  ;;  %v1340_v3 = vadd.f32 %v1324_v63, %v1308_v24  ;;  %v1137_v54 = vadd.f32 %v4546_v17, %v4545_v37  ;;  %v1140_v5 = vadd.f32 %v4548_v59, %v4547_v55  ;;  %v1312_v62 = vmul.f32 %v1152_v4, %v3349_v51 }
 0x253   :  { %v1327_v14 = vmul.f32 %v1295_v39, %v3344_v50  ;;  %v1293_v10 = vmax.f32 %v1277_v26, 0.0  ;;  %v1280_v52 = vadd.f32 %v3622_v11, %v1264_v38  ;;  %v1262_v9 = vadd.f32 %v3817_v43, %v1097_v61 }
 0x254   :  { %v2687_v47 = vpop.f32.mrf.mxu1  ;;  %v1338_v31 = vadd.f32 %v1322_v6, %v1306_v18  ;;  %v1360_v56 = vpack.c.bf16 %v1340_v3, %v1339_v20  ;;  %v1153_v18 = vmax.f32 %v1137_v54, 0.0  ;;  %v1310_v26 = vmul.f32 %v1150_v13, %v3349_v51 }
 0x255   :  { %v1325_v15 = vmul.f32 %v1293_v10, %v3344_v50  ;;  %v1296_v46 = vmax.f32 %v1280_v52, 0.0  ;;  %v1278_v41 = vadd.f32 %v3622_v11, %v1262_v9  ;;  %v1267_v24 = vadd.f32 %v2687_v47, %v3824_v57 }
 0x256   :  { %v1110_v42 = vpop.f32.mrf.mxu1  ;;  %v1359_v43 = vpack.c.bf16 %v1338_v31, %v1337_v53  ;;  %v1343_v40 = vadd.f32 %v1327_v14, %v1311_v49  ;;  %v1138_v57 = vadd.f32 %v3780_v36, %v4549_v22  ;;  %v1156_v38 = vmax.f32 %v1140_v5, 0.0 }
 0x257   :  { %v1328_v63 = vmul.f32 %v1296_v46, %v3344_v50  ;;  %v1294_v8 = vmax.f32 %v1278_v41, 0.0  ;;  %v1283_v16 = vadd.f32 %v3622_v11, %v1267_v24  ;;  %v1265_v20 = vadd.f32 %v3828_v60, %v1110_v42 }
 0x258   :  { %2725 = vmatprep.mubr.bf16.mxu0 %v1359_v43  ;;  %v2688_v0 = vpop.f32.mrf.mxu1  ;;  %v1341_v33 = vadd.f32 %v1325_v15, %v1309_v58  ;;  %v1315_v60 = vmul.f32 %v1155_v44, %v3349_v51  ;;  %v1313_v61 = vmul.f32 %v1153_v18, %v3349_v51  ;;  %v1154_v3 = vmax.f32 %v1138_v57, 0.0 }
 0x259   :  { %v1326_v6 = vmul.f32 %v1294_v8, %v3344_v50  ;;  %v1299_v53 = vmax.f32 %v1283_v16, 0.0  ;;  %v1281_v49 = vadd.f32 %v3622_v11, %v1265_v20  ;;  %v1268_v39 = vadd.f32 %v2688_v0, %v3834_v23  ;;  %2726 = vmatmul.mubr.bf16.gmra.mxu0 %v1360_v56 }
 0x25a   :  { %v1113_v4 = vpop.f32.mrf.mxu1  ;;  %v1344_v19 = vadd.f32 %v1328_v63, %v1312_v62  ;;  %v1316_v17 = vmul.f32 %v1156_v38, %v3349_v51 }
 0x25b   :  { %v1331_v36 = vmul.f32 %v1299_v53, %v3344_v50  ;;  %v1297_v27 = vmax.f32 %v1281_v49, 0.0  ;;  %v1284_v58 = vadd.f32 %v3622_v11, %v1268_v39  ;;  %v1266_v29 = vadd.f32 %v3839_v21, %v1113_v4 }
 0x25c   :  { %v1342_v14 = vadd.f32 %v1326_v6, %v1310_v26  ;;  %v1362_v23 = vpack.c.bf16 %v1344_v19, %v1343_v40  ;;  %v1314_v21 = vmul.f32 %v1154_v3, %v3349_v51 }
 0x25d   :  { %v1329_v10 = vmul.f32 %v1297_v27, %v3344_v50  ;;  %v1300_v52 = vmax.f32 %v1284_v58, 0.0  ;;  %v1282_v9 = vadd.f32 %v3622_v11, %v1266_v29  ;;  %v1347_v13 = vadd.f32 %v1331_v36, %v1315_v60 }
 0x25e   :  { %v1361_v37 = vpack.c.bf16 %v1342_v14, %v1341_v33  ;;  %v2974_v11 = vmov 0.0  }
 0x25f   :  { %v1332_v54 = vmul.f32 %v1300_v52, %v3344_v50  ;;  %v1298_v47 = vmax.f32 %v1282_v9, 0.0  ;;  %v1345_v31 = vadd.f32 %v1329_v10, %v1313_v61  ;;  %1598 = vst [vmem:[#allocation3] sm:$0xff] %v2974_v11  ;;  %1599 = vst [vmem:[#allocation3 + $0x8] sm:$0xff] %v2974_v11 }
 0x260   :  { %2729 = vmatprep.mubr.bf16.mxu0 %v1361_v37  ;;  %1600 = vst [vmem:[#allocation3 + $0x10] sm:$0xff] %v2974_v11  ;;  %1601 = vst [vmem:[#allocation3 + $0x18] sm:$0xff] %v2974_v11 }
 0x261   :  { %v1330_v56 = vmul.f32 %v1298_v47, %v3344_v50  ;;  %2730 = vmatmul.mubr.bf16.gmra.mxu0 %v1362_v23  ;;  %v1348_v15 = vadd.f32 %v1332_v54, %v1316_v17  ;;  %1602 = vst [vmem:[#allocation3 + $0x20] sm:$0xff] %v2974_v11  ;;  %1603 = vst [vmem:[#allocation3 + $0x28] sm:$0xff] %v2974_v11 }
 0x262   :  { %1604 = vst [vmem:[#allocation3 + $0x30] sm:$0xff] %v2974_v11  ;;  %1605 = vst [vmem:[#allocation3 + $0x38] sm:$0xff] %v2974_v11 }
 0x263   :  { %v1346_v46 = vadd.f32 %v1330_v56, %v1314_v21  ;;  %v1364_v41 = vpack.c.bf16 %v1348_v15, %v1347_v13  ;;  %1606 = vst [vmem:[#allocation3 + $0x40] sm:$0xff] %v2974_v11  ;;  %1607 = vst [vmem:[#allocation3 + $0x48] sm:$0xff] %v2974_v11 }
 0x264   :  { %1608 = vst [vmem:[#allocation3 + $0x50] sm:$0xff] %v2974_v11  ;;  %1609 = vst [vmem:[#allocation3 + $0x58] sm:$0xff] %v2974_v11 }
 0x265   :  { %v1363_v24 = vpack.c.bf16 %v1346_v46, %v1345_v31  ;;  %1610 = vst [vmem:[#allocation3 + $0x60] sm:$0xff] %v2974_v11  ;;  %1611 = vst [vmem:[#allocation3 + $0x68] sm:$0xff] %v2974_v11 }
 0x266   :  { %1612 = vst [vmem:[#allocation3 + $0x70] sm:$0xff] %v2974_v11  ;;  %1613 = vst [vmem:[#allocation3 + $0x78] sm:$0xff] %v2974_v11 }
 0x267   :  { %2733 = vmatprep.mubr.bf16.mxu0 %v1363_v24 }
 0x269   :  { %2734 = vmatmul.mubr.bf16.gmra.mxu0 %v1364_v41 }
 0x2c6   :  { %v3916_v44 = vpop.f32.mrf.mxu0 }
 0x2c7   :  { %1584 = vst [vmem:[#allocation2 + $0x10] sm:$0xff] %v3916_v44 }
 0x2c8   :  { %v3919_v55 = vpop.f32.mrf.mxu0 }
 0x2c9   :  { %1582 = vst [vmem:[#allocation2] sm:$0xff] %v3919_v55 }
 0x2ca   :  { %v3922_v59 = vpop.f32.mrf.mxu0 }
 0x2cb   :  { %1585 = vst [vmem:[#allocation2 + $0x18] sm:$0xff] %v3922_v59 }
 0x2cc   :  { %v3925_v5 = vpop.f32.mrf.mxu0 }
 0x2cd   :  { %1583 = vst [vmem:[#allocation2 + $0x8] sm:$0xff] %v3925_v5 }
 0x2ce   :  { %v3928_v42 = vpop.f32.mrf.mxu0 }
 0x2cf   :  { %1588 = vst [vmem:[#allocation2 + $0x30] sm:$0xff] %v3928_v42 }
 0x2d0   :  { %v3931_v43 = vpop.f32.mrf.mxu0 }
 0x2d1   :  { %1586 = vst [vmem:[#allocation2 + $0x20] sm:$0xff] %v3931_v43 }
 0x2d2   :  { %v3934_v40 = vpop.f32.mrf.mxu0 }
 0x2d3   :  { %1589 = vst [vmem:[#allocation2 + $0x38] sm:$0xff] %v3934_v40 }
 0x2d4   :  { %v3937_v63 = vpop.f32.mrf.mxu0 }
 0x2d5   :  { %1587 = vst [vmem:[#allocation2 + $0x28] sm:$0xff] %v3937_v63 }
 0x2d6   :  { %v3940_v8 = vpop.f32.mrf.mxu0 }
 0x2d7   :  { %1592 = vst [vmem:[#allocation2 + $0x50] sm:$0xff] %v3940_v8 }
 0x2d8   :  { %v3943_v16 = vpop.f32.mrf.mxu0 }
 0x2d9   :  { %1590 = vst [vmem:[#allocation2 + $0x40] sm:$0xff] %v3943_v16 }
 0x2da   :  { %v3946_v20 = vpop.f32.mrf.mxu0 }
 0x2db   :  { %1593 = vst [vmem:[#allocation2 + $0x58] sm:$0xff] %v3946_v20 }
 0x2dc   :  { %v3949_v62 = vpop.f32.mrf.mxu0 }
 0x2dd   :  { %1591 = vst [vmem:[#allocation2 + $0x48] sm:$0xff] %v3949_v62 }
 0x2de   :  { %v3952_v18 = vpop.f32.mrf.mxu0 }
 0x2df   :  { %1596 = vst [vmem:[#allocation2 + $0x70] sm:$0xff] %v3952_v18 }
 0x2e0   :  { %v3955_v22 = vpop.f32.mrf.mxu0 }
 0x2e1   :  { %1594 = vst [vmem:[#allocation2 + $0x60] sm:$0xff] %v3955_v22 }
 0x2e2   :  { %v3958_v57 = vpop.f32.mrf.mxu0 }
 0x2e3   :  { %1597 = vst [vmem:[#allocation2 + $0x78] sm:$0xff] %v3958_v57 }
 0x2e4   :  { %v3961_v0 = vpop.f32.mrf.mxu0 }
 0x2e5   :  { %1595 = vst [vmem:[#allocation2 + $0x68] sm:$0xff] %v3961_v0 }
 0x311   :  { %v2723_v33 = vpop.f32.mrf.mxu0 }
 0x313   :  { %v1511_v6 = vpop.f32.mrf.mxu0 }
 0x315   :  { %v2724_v53 = vpop.f32.mrf.mxu0 }
 0x316   :  { %v1575_v49 = vpack.c.bf16 %v2724_v53, %v2723_v33 }
 0x317   :  { %v1514_v39 = vpop.f32.mrf.mxu0 }
 0x318   :  { %v1574_v26 = vpack.c.bf16 %v1514_v39, %v1511_v6 }
 0x319   :  { %v2727_v60 = vpop.f32.mrf.mxu0 }
 0x31b   :  { %v1527_v38 = vpop.f32.mrf.mxu0 }
 0x31d   :  { %v2728_v4 = vpop.f32.mrf.mxu0 }
 0x31e   :  { %v1577_v19 = vpack.c.bf16 %v2728_v4, %v2727_v60 }
 0x31f   :  { %v1530_v36 = vpop.f32.mrf.mxu0 }
 0x320   :  { %v1576_v27 = vpack.c.bf16 %v1530_v36, %v1527_v38 }
 0x321   :  { %v2731_v58 = vpop.f32.mrf.mxu0 }
 0x323   :  { %v1543_v29 = vpop.f32.mrf.mxu0 }
 0x325   :  { %v2732_v61 = vpop.f32.mrf.mxu0 }
 0x326   :  { %v1579_v3 = vpack.c.bf16 %v2732_v61, %v2731_v58 }
 0x327   :  { %v1546_v14 = vpop.f32.mrf.mxu0 }
 0x328   :  { %v1578_v23 = vpack.c.bf16 %v1546_v14, %v1543_v29 }
 0x329   :  { %v2735_v10 = vpop.f32.mrf.mxu0 }
 0x32b   :  { %v1559_v52 = vpop.f32.mrf.mxu0 }
 0x32d   :  { %v2736_v9 = vpop.f32.mrf.mxu0 }
 0x32e   :  { %v1581_v13 = vpack.c.bf16 %v2736_v9, %v2735_v10 }
 0x32f   :  { %v1562_v37 = vpop.f32.mrf.mxu0 }
 0x330   :  { %v1580_v17 = vpack.c.bf16 %v1562_v37, %v1559_v52 }
 0x331 LB: > { %s1620_s1 = sld [smem:[#allocation5 + %s2970_s6]]  ;;  %s1623_s26 = scalar_lea.vmem [#allocation3], %s2970_s6  ;;  %s2970_s6 = sphi %s2968_s6, %s1619_s6  }
 0x332   : > { %s1619_s6 = sadd.s32 1, %s2970_s6  }
 0x333   : > { %p1616_p5 = scmp.ge.s32.totalorder %s1619_s6, 64  }
 0x334   :  { %2737 = vmatprep.subr.bf16.mxu1 (%p1616_p5), %v1581_v13  ;;  %v4550_v47 = vld [vmem:[#allocation25_spill] sm:$0xff] (%p1616_p5)  ;;  %v4551_v31 = vld [vmem:[#allocation26_spill] sm:$0xff] (%p1616_p5)  ;;  %v4552_v21 = vld [vmem:[#allocation27_spill] sm:$0xff] (%p1616_p5) }
 0x335   :  { %1618 = sbr.rel (!%p1616_p5) target bundleno = 817 (0x331), region = 77  ;;  %2753 = vmatprep.mubr.bf16.mxu1 (%p1616_p5), %v4550_v47  ;;  %2738 = vmatpush3.bf16.msra.mxu1 (%p1616_p5), %v1581_v13  ;;  %v4553_v56 = vld [vmem:[#allocation28_spill] sm:$0xff] (%p1616_p5)  ;;  %v4554_v15 = vld [vmem:[#allocation29_spill] sm:$0xff] (%p1616_p5)  ;;  %v4555_v46 = vld [vmem:[#allocation30_spill] sm:$0xff] (%p1616_p5) }
 0x336   :  { %2739 = vmatprep.subr.bf16.mxu1 (%p1616_p5), %v1580_v17  ;;  %v4556_v41 = vld [vmem:[#allocation31_spill] sm:$0xff] (%p1616_p5)  ;;  %v4557_v24 = vld [vmem:[#allocation32_spill] sm:$0xff] (%p1616_p5)  ;;  %v4558_v11 = vld [vmem:[#allocation33_spill] sm:$0xff] (%p1616_p5) }
 0x337   : > { %s1621_s25 = scalar_lea.vmem [#allocation2], %s1620_s1  ;;  %v4559_v33 = vld [vmem:[#allocation34_spill] sm:$0xff] (%p1616_p5)  ;;  %v4560_v6 = vld [vmem:[#allocation35_spill] sm:$0xff] (%p1616_p5)  ;;  %v4561_v53 = vld [vmem:[#allocation36_spill] sm:$0xff] (%p1616_p5) }
 0x338   : > { %v1622_v54 = vld [vmem:[%s1621_s25] sm:$0x1]  ;;  %v4563_v39 = vld [vmem:[#allocation38_spill] sm:$0xff] (%p1616_p5)  ;;  %v4566_v38 = vld [vmem:[#allocation23_spill] sm:$0xff] (%p1616_p5) }
 0x339   : > { %1624 = vst [vmem:[%s1623_s26] sm:$0x1] %v1622_v54  ;;  %2740 = vmatpush3.bf16.msra.mxu1 (%p1616_p5), %v1580_v17  ;;  %v4565_v60 = vld [vmem:[#allocation40_spill] sm:$0xff] (%p1616_p5)  ;;  %v4567_v4 = vld [vmem:[#allocation22_spill] sm:$0xff] (%p1616_p5)  ;;  %v4568_v36 = vld [vmem:[#allocation21_spill] sm:$0xff] (%p1616_p5) }
 0x33a   :  { %2741 = vmatprep.subr.bf16.mxu1 %v1579_v3  ;;  %v4570_v29 = vld [vmem:[#allocation19_spill] sm:$0xff]  ;;  %v4571_v61 = vld [vmem:[#allocation18_spill] sm:$0xff]  ;;  %v4572_v14 = vld [vmem:[#allocation17_spill] sm:$0xff] }
 0x33b   :  { %v4574_v52 = vld [vmem:[#allocation15_spill] sm:$0xff]  ;;  %v4575_v9 = vld [vmem:[#allocation14_spill] sm:$0xff]  ;;  %v4576_v37 = vld [vmem:[#allocation13_spill] sm:$0xff] }
 0x33c   :  { %v2428_v13 = vcombine.low %v4575_v9, %v4574_v52  ;;  %v4577_v17 = vld [vmem:[#allocation12_spill] sm:$0xff]  ;;  %v4578_v47 = vld [vmem:[#allocation11_spill] sm:$0xff]  ;;  %v4587_v9 = vld [vmem:[#allocation45_spill] sm:$0xff] }
 0x33d   :  { %2742 = vmatpush3.bf16.msra.mxu1 %v1579_v3  ;;  %v2430_v3 = vcombine.low %v4571_v61, %v4570_v29  ;;  %v2427_v54 = vcombine.low %v4577_v17, %v4576_v37  ;;  %v4584_v29 = vld [vmem:[#allocation44_spill] sm:$0xff] }
 0x33e   :  { %2743 = vmatprep.subr.bf16.mxu1 %v1578_v23  ;;  %v1805_v61 = vmul.f32 %v3922_v59, %v4584_v29  ;;  %v4588_v37 = vld [vmem:[#allocation48_spill] sm:$0xff]  ;;  %v4590_v59 = vld [vmem:[#allocation51_spill] sm:$0xff] }
 0x33f   :  { %v1809_v17 = vmul.f32 %v3934_v40, %v4588_v37  ;;  %v4593_v40 = vld [vmem:[#allocation50_spill] sm:$0xff] }
 0x340   :  { %v4597_v37 = vld [vmem:[#allocation54_spill] sm:$0xff] }
 0x341   :  { %2744 = vmatpush3.bf16.msra.mxu1 %v1578_v23  ;;  %v4573_v23 = vld [vmem:[#allocation16_spill] sm:$0xff] }
 0x342   :  { %2745 = vmatprep.subr.bf16.mxu1 %v1577_v19  ;;  %v2429_v10 = vcombine.low %v4573_v23, %v4572_v14 }
 0x345   :  { %2746 = vmatpush3.bf16.msra.mxu1 %v1577_v19  ;;  %v2432_v19 = vcombine.low %v4567_v4, %v4566_v38  ;;  %v4582_v4 = vld [vmem:[#allocation42_spill] sm:$0xff] }
 0x346   :  { %2747 = vmatprep.subr.bf16.mxu1 %v1576_v27 }
 0x347   :  { %2785 = vmatprep.subr.bf16.mxu0 %v2432_v19 }
 0x348   :  { %2786 = vmatpush3.bf16.msra.mxu0 %v2432_v19  ;;  %v1804_v19 = vmul.f32 %v3916_v44, %v4582_v4 }
 0x349   :  { %2748 = vmatpush3.bf16.msra.mxu1 %v1576_v27  ;;  %v4569_v27 = vld [vmem:[#allocation20_spill] sm:$0xff] }
 0x34a   :  { %2749 = vmatprep.subr.bf16.mxu1 %v1575_v49  ;;  %v2431_v58 = vcombine.low %v4569_v27, %v4568_v36  ;;  %v4583_v27 = vld [vmem:[#allocation41_spill] sm:$0xff] }
 0x34c   :  { %2787 = vmatprep.subr.bf16.mxu0 %v2431_v58 }
 0x34d   :  { %2750 = vmatpush3.bf16.msra.mxu1 %v1575_v49  ;;  %v4562_v49 = vld [vmem:[#allocation37_spill] sm:$0xff]  ;;  %2788 = vmatpush3.bf16.msra.mxu0 %v2431_v58  ;;  %v1802_v58 = vmul.f32 %v3919_v55, %v4583_v27  ;;  %v4594_v27 = vld [vmem:[#allocation55_spill] sm:$0xff] }
 0x34e   :  { %2751 = vmatprep.subr.bf16.mxu1 %v1574_v26  ;;  %2789 = vmatprep.subr.bf16.mxu0 %v2430_v3 }
 0x351   :  { %2752 = vmatpush3.bf16.msra.mxu1 %v1574_v26  ;;  %v4564_v26 = vld [vmem:[#allocation39_spill] sm:$0xff]  ;;  %2790 = vmatpush3.bf16.msra.mxu0 %v2430_v3 }
 0x352   :  { %2791 = vmatprep.subr.bf16.mxu0 %v2429_v10  ;;  %v4585_v3 = vld [vmem:[#allocation43_spill] sm:$0xff] }
 0x353   :  { %v1803_v14 = vmul.f32 %v3925_v5, %v4585_v3  ;;  %v1629_v3 = vld [vmem:[#allocation3 + $0x20] sm:$0xff] }
 0x354   :  { %2754 = vmatmul.mubr.bf16.vlgmr.msra.gmra.mxu1 %v4551_v31  ;;  %v4579_v31 = vld [vmem:[#allocation10_spill] sm:$0xff] }
 0x355   :  { %2757 = vmatprep.mubr.bf16.mxu1 %v4552_v21  ;;  %2792 = vmatpush3.bf16.msra.mxu0 %v2429_v10  ;;  %v2426_v21 = vcombine.low %v4579_v31, %v4578_v47  ;;  %v4586_v10 = vld [vmem:[#allocation47_spill] sm:$0xff]  ;;  %v4030_v47 = vmul.f32 %v3940_v8, %v4590_v59  ;;  %v1627_v31 = vld [vmem:[#allocation3 + $0x10] sm:$0xff]  ;;  %v1626_v8 = vld [vmem:[#allocation3 + $0x8] sm:$0xff] }
 0x356   :  { %2793 = vmatprep.subr.bf16.mxu0 %v2428_v13  ;;  %v1808_v52 = vmul.f32 %v3928_v42, %v4586_v10  ;;  %v4591_v42 = vld [vmem:[#allocation49_spill] sm:$0xff] }
 0x359   :  { %2794 = vmatpush3.bf16.msra.mxu0 %v2428_v13  ;;  %v1806_v13 = vmul.f32 %v3931_v43, %v4587_v9  ;;  %v4592_v43 = vld [vmem:[#allocation52_spill] sm:$0xff] }
 0x35a   :  { %2795 = vmatprep.subr.bf16.mxu0 %v2427_v54 }
 0x35c   :  { %2758 = vmatmul.mubr.bf16.gmra.mxu1 %v4553_v56  ;;  %v4580_v56 = vld [vmem:[#allocation9_spill] sm:$0xff] }
 0x35d   :  { %2761 = vmatprep.mubr.bf16.mxu1 %v4554_v15  ;;  %2796 = vmatpush3.bf16.msra.mxu0 %v2427_v54  ;;  %v4581_v15 = vld [vmem:[#allocation8_spill] sm:$0xff]  ;;  %v4589_v54 = vld [vmem:[#allocation46_spill] sm:$0xff] }
 0x35e   :  { %2797 = vmatprep.subr.bf16.mxu0 %v2426_v21  ;;  %v4026_v55 = vmul.f32 %v3937_v63, %v4589_v54  ;;  %v4044_v63 = vmul.f32 %v3949_v62, %v4593_v40  ;;  %v4596_v62 = vld [vmem:[#allocation56_spill] sm:$0xff] }
 0x35f   :  { %v4058_v9 = vmul.f32 %v3958_v57, %v4596_v62  ;;  %v4599_v54 = vld [vmem:[#allocation24_spill] sm:$0xff]  ;;  %v1635_v57 = vld [vmem:[#allocation3 + $0x50] sm:$0xff]  ;;  %v1636_v62 = vld [vmem:[#allocation3 + $0x58] sm:$0xff] }
 0x360   :  { %v1633_v40 = vld [vmem:[#allocation3 + $0x40] sm:$0xff] }
 0x361   :  { %2798 = vmatpush3.bf16.msra.mxu0 %v2426_v21 }
 0x364   :  { %2762 = vmatmul.mubr.bf16.gmra.mxu1 %v4555_v46  ;;  %v2425_v46 = vcombine.low %v4581_v15, %v4580_v56  ;;  %v4036_v56 = vmul.f32 %v3943_v16, %v4591_v42  ;;  %v4040_v15 = vmul.f32 %v3946_v20, %v4592_v43  ;;  %v1631_v20 = vld [vmem:[#allocation3 + $0x30] sm:$0xff] }
 0x365   :  { %2765 = vmatprep.mubr.bf16.mxu1 %v4556_v41  ;;  %v4600_v42 = vld [vmem:[#allocation58_spill] sm:$0xff] }
 0x366   :  { %2799 = vmatprep.subr.bf16.mxu0 %v2425_v46 }
 0x367   :  { %2800 = vmatpush3.bf16.msra.mxu0 %v2425_v46  ;;  %v1625_v46 = vld [vmem:[#allocation3] sm:$0xff] }
 0x368   :  { %v1872_v43 = vmul.f32 %v1625_v46, %v4600_v42 }
 0x36c   :  { %2766 = vmatmul.mubr.bf16.gmra.mxu1 %v4557_v24 }
 0x36d   :  { %2769 = vmatprep.mubr.bf16.mxu1 %v4558_v11 }
 0x374   :  { %2770 = vmatmul.mubr.bf16.gmra.mxu1 %v4559_v33 }
 0x375   :  { %2773 = vmatprep.mubr.bf16.mxu1 %v4560_v6 }
 0x37c   :  { %2774 = vmatmul.mubr.bf16.gmra.mxu1 %v4561_v53 }
 0x37d   :  { %2777 = vmatprep.mubr.bf16.mxu1 %v4562_v49 }
 0x384   :  { %2778 = vmatmul.mubr.bf16.gmra.mxu1 %v4563_v39 }
 0x385   :  { %2781 = vmatprep.mubr.bf16.mxu1 %v4564_v26 }
 0x38c   :  { %2782 = vmatmul.mubr.bf16.gmra.mxu1 %v4565_v60 }
 0x414   :  { %v2755_v41 = vpop.f32.mrf.mxu1 }
 0x415   :  { %v1820_v44 = vadd.f32 %v2755_v41, %v1804_v19  ;;  %v1628_v41 = vld [vmem:[#allocation3 + $0x18] sm:$0xff] }
 0x416   :  { %v1675_v24 = vpop.f32.mrf.mxu1 }
 0x417   :  { %v1818_v21 = vadd.f32 %v1802_v58, %v1675_v24  ;;  %v4048_v24 = vmul.f32 %v3952_v18, %v4594_v27  ;;  %v4595_v58 = vld [vmem:[#allocation53_spill] sm:$0xff] }
 0x418   :  { %v2756_v11 = vpop.f32.mrf.mxu1  ;;  %v4052_v16 = vmul.f32 %v3955_v22, %v4595_v58  ;;  %v1842_v22 = vadd.f32 %v4599_v54, %v1820_v44  ;;  %v1878_v58 = vmul.f32 %v1631_v20, %v3746_v35  ;;  %v1639_v44 = vld [vmem:[#allocation3 + $0x70] sm:$0xff]  ;;  %v4082_v35 = vmul.f32 %v1635_v57, %v3760_v34 }
 0x419   :  { %v1821_v4 = vadd.f32 %v2756_v11, %v1805_v61  ;;  %v4062_v11 = vmul.f32 %v3961_v0, %v4597_v37  ;;  %v1632_v61 = vld [vmem:[#allocation3 + $0x38] sm:$0xff]  ;;  %v1840_v27 = vadd.f32 %v4599_v54, %v1818_v21  ;;  %v1634_v37 = vld [vmem:[#allocation3 + $0x48] sm:$0xff] }
 0x41a   :  { %v1678_v33 = vpop.f32.mrf.mxu1  ;;  %v1640_v21 = vld [vmem:[#allocation3 + $0x78] sm:$0xff] }
 0x41b   :  { %v1819_v19 = vadd.f32 %v1803_v14, %v1678_v33  ;;  %v4598_v33 = vld [vmem:[#allocation62_spill] sm:$0xff]  ;;  %v1630_v14 = vld [vmem:[#allocation3 + $0x28] sm:$0xff] }
 0x41c   :  { %v2759_v6 = vpop.f32.mrf.mxu1  ;;  %v1874_v18 = vmul.f32 %v1627_v31, %v4598_v33  ;;  %v1876_v31 = vmul.f32 %v1629_v3, %v3742_v2  ;;  %v1843_v33 = vadd.f32 %v4599_v54, %v1821_v4  ;;  %v4085_v2 = vmul.f32 %v1633_v40, %v3750_v48  ;;  %v1638_v48 = vld [vmem:[#allocation3 + $0x68] sm:$0xff] }
 0x41d   :  { %v1824_v10 = vadd.f32 %v2759_v6, %v1808_v52  ;;  %v1875_v6 = vmul.f32 %v1628_v41, %v3740_v12  ;;  %v1873_v52 = vmul.f32 %v1626_v8, %v3730_v30  ;;  %v1841_v46 = vadd.f32 %v4599_v54, %v1819_v19  ;;  %v1637_v41 = vld [vmem:[#allocation3 + $0x60] sm:$0xff] }
 0x41e   :  { %v1691_v53 = vpop.f32.mrf.mxu1  ;;  %v1879_v12 = vmul.f32 %v1632_v61, %v3748_v7  ;;  %v4078_v30 = vmul.f32 %v1630_v14, %v3744_v32  ;;  %v1858_v8 = vmax.f32 %v1842_v22, 0.0  ;;  %v4088_v19 = vmul.f32 %v1636_v62, %v3764_v1  ;;  %v4601_v7 = vld [vmem:[#allocation63_spill] sm:$0xff]  ;;  %v4602_v32 = vld [vmem:[#allocation68_spill] sm:$0xff] }
 0x41f   :  { %v1822_v0 = vadd.f32 %v1806_v13, %v1691_v53  ;;  %v1846_v53 = vadd.f32 %v4599_v54, %v1824_v10  ;;  %v4091_v20 = vmul.f32 %v1634_v37, %v4601_v7  ;;  %v4094_v3 = vmul.f32 %v1639_v44, %v4602_v32 }
 0x420   :  { %v3996_v49 = vpop.f32.mrf.mxu1  ;;  %v1856_v10 = vmax.f32 %v1840_v27, 0.0  ;;  %v4098_v61 = vmul.f32 %v1637_v41, %v3770_v25  ;;  %v1859_v14 = vmax.f32 %v1843_v33, 0.0  ;;  %v1857_v22 = vmax.f32 %v1841_v46, 0.0 }
 0x421   :  { %v1825_v57 = vadd.f32 %v3996_v49, %v1809_v17  ;;  %v4102_v40 = vmul.f32 %v1640_v21, %v3819_v28  ;;  %v1862_v62 = vmax.f32 %v1846_v53, 0.0  ;;  %v4112_v49 = vmul.f32 %v1638_v48, %v3774_v45 }
 0x422   :  { %v3998_v39 = vpop.f32.mrf.mxu1  ;;  %v1936_v28 = vmul.f32 %v1856_v10, %v3349_v51  ;;  %v1937_v41 = vmul.f32 %v1857_v22, %v3349_v51 }
 0x423   :  { %v1823_v25 = vadd.f32 %v4026_v55, %v3998_v39  ;;  %v1847_v53 = vadd.f32 %v4599_v54, %v1825_v57 }
 0x424   :  { %v4000_v26 = vpop.f32.mrf.mxu1 }
 0x425   :  { %v1845_v21 = vadd.f32 %v4599_v54, %v1823_v25  ;;  %v1863_v48 = vmax.f32 %v1847_v53, 0.0 }
 0x426   :  { %v4002_v60 = vpop.f32.mrf.mxu1 }
 0x428   :  { %v4004_v38 = vpop.f32.mrf.mxu1 }
 0x42a   :  { %v4008_v36 = vpop.f32.mrf.mxu1 }
 0x42c   :  { %v4016_v23 = vpop.f32.mrf.mxu1 }
 0x42e   :  { %v4032_v5 = vpop.f32.mrf.mxu1 }
 0x430   :  { %v4054_v29 = vpop.f32.mrf.mxu1 }
 0x432   :  { %v4066_v59 = vpop.f32.mrf.mxu1 }
 0x434   :  { %v2771_v42 = vpop.f32.mrf.mxu1 }
 0x435   :  { %v1890_v13 = vadd.f32 %v2771_v42, %v1874_v18  ;;  %v1844_v18 = vadd.f32 %v4599_v54, %v1822_v0  ;;  %v1826_v0 = vadd.f32 %v4036_v56, %v4002_v60  ;;  %v4120_v60 = vmul.f32 %v1862_v62, %v3349_v51 }
 0x436   :  { %v1739_v4 = vpop.f32.mrf.mxu1 }
 0x437   :  { %v1888_v34 = vadd.f32 %v1872_v43, %v1739_v4  ;;  %v1906_v37 = vadd.f32 %v4599_v54, %v1890_v13  ;;  %v1938_v43 = vmul.f32 %v1858_v8, %v3349_v51  ;;  %v1860_v17 = vmax.f32 %v1844_v18, 0.0 }
 0x438   :  { %v2772_v1 = vpop.f32.mrf.mxu1  ;;  %v1848_v8 = vadd.f32 %v4599_v54, %v1826_v0 }
 0x439   :  { %v1904_v27 = vadd.f32 %v4599_v54, %v1888_v34  ;;  %v1891_v44 = vadd.f32 %v2772_v1, %v1875_v6  ;;  %v1939_v6 = vmul.f32 %v1859_v14, %v3349_v51  ;;  %v1922_v56 = vmax.f32 %v1906_v37, 0.0 }
 0x43a   :  { %v1742_v33 = vpop.f32.mrf.mxu1  ;;  %v1940_v32 = vmul.f32 %v1860_v17, %v3349_v51  ;;  %v1829_v14 = vadd.f32 %v4004_v38, %v4040_v15  ;;  %v1861_v37 = vmax.f32 %v1845_v21, 0.0  ;;  %v1827_v38 = vadd.f32 %v4044_v63, %v4008_v36 }
 0x43b   :  { %v1907_v46 = vadd.f32 %v4599_v54, %v1891_v44  ;;  %v1889_v42 = vadd.f32 %v1873_v52, %v1742_v33  ;;  %v1920_v39 = vmax.f32 %v1904_v27, 0.0  ;;  %v1828_v52 = vadd.f32 %v4000_v26, %v4030_v47 }
 0x43c   :  { %v2775_v55 = vpop.f32.mrf.mxu1  ;;  %v1954_v26 = vmul.f32 %v1922_v56, %v3344_v50  ;;  %v1851_v17 = vadd.f32 %v4599_v54, %v1829_v14  ;;  %v1943_v36 = vmul.f32 %v1863_v48, %v3349_v51  ;;  %v1941_v63 = vmul.f32 %v1861_v37, %v3349_v51 }
 0x43d   :  { %v1923_v45 = vmax.f32 %v1907_v46, 0.0  ;;  %v1905_v13 = vadd.f32 %v4599_v54, %v1889_v42  ;;  %v1894_v4 = vadd.f32 %v2775_v55, %v1878_v58  ;;  %v1952_v22 = vmul.f32 %v1920_v39, %v3344_v50 }
 0x43e   :  { %v1755_v7 = vpop.f32.mrf.mxu1  ;;  %v4137_v27 = vadd.f32 %v4599_v54, %v1828_v52  ;;  %v1970_v39 = vadd.f32 %v1954_v26, %v1938_v43 }
 0x43f   :  { %v1955_v10 = vmul.f32 %v1923_v45, %v3344_v50  ;;  %v1921_v18 = vmax.f32 %v1905_v13, 0.0  ;;  %v1892_v34 = vadd.f32 %v1876_v31, %v1755_v7  ;;  %v1910_v57 = vadd.f32 %v4599_v54, %v1894_v4 }
 0x440   :  { %v2776_v1 = vpop.f32.mrf.mxu1  ;;  %v1864_v31 = vmax.f32 %v1848_v8, 0.0  ;;  %v1968_v53 = vadd.f32 %v1952_v22, %v1936_v28  ;;  %v1866_v13 = vmax.f32 %v4137_v27, 0.0  ;;  %v1830_v22 = vadd.f32 %v4052_v16, %v4032_v5 }
 0x441   :  { %v1953_v47 = vmul.f32 %v1921_v18, %v3344_v50  ;;  %v1908_v58 = vadd.f32 %v4599_v54, %v1892_v34  ;;  %v1895_v62 = vadd.f32 %v2776_v1, %v1879_v12  ;;  %v1971_v44 = vadd.f32 %v1955_v10, %v1939_v6 }
 0x442   :  { %v1758_v15 = vpop.f32.mrf.mxu1  ;;  %v1926_v46 = vmax.f32 %v1910_v57, 0.0  ;;  %v1849_v6 = vadd.f32 %v4599_v54, %v1827_v38  ;;  %v1944_v43 = vmul.f32 %v1864_v31, %v3349_v51  ;;  %v1867_v10 = vmax.f32 %v1851_v17, 0.0 }
 0x443   :  { %v1911_v25 = vadd.f32 %v4599_v54, %v1895_v62  ;;  %v1893_v0 = vadd.f32 %v4078_v30, %v1758_v15  ;;  %v1969_v33 = vadd.f32 %v1953_v47, %v1937_v41  ;;  %v1924_v42 = vmax.f32 %v1908_v58, 0.0 }
 0x444   :  { %v2779_v12 = vpop.f32.mrf.mxu1  ;;  %v1985_v28 = vpack.c.bf16 %v1971_v44, %v1970_v39  ;;  %v1958_v8 = vmul.f32 %v1926_v46, %v3344_v50  ;;  %v1865_v14 = vmax.f32 %v1849_v6, 0.0  ;;  %v1833_v57 = vadd.f32 %v4054_v29, %v4058_v9 }
 0x445   :  { %v1927_v55 = vmax.f32 %v1911_v25, 0.0  ;;  %v1909_v56 = vadd.f32 %v4599_v54, %v1893_v0  ;;  %v1898_v45 = vadd.f32 %v2779_v12, %v4082_v35  ;;  %v1984_v41 = vpack.c.bf16 %v1969_v33, %v1968_v53 }
 0x446   :  { %v1771_v30 = vpop.f32.mrf.mxu1  ;;  %v1956_v35 = vmul.f32 %v1924_v42, %v3344_v50  ;;  %v1974_v37 = vadd.f32 %v1958_v8, %v4120_v60  ;;  %v1947_v15 = vmul.f32 %v1867_v10, %v3349_v51  ;;  %v1832_v44 = vadd.f32 %v4016_v23, %v4048_v24 }
 0x447   :  { %v1959_v21 = vmul.f32 %v1927_v55, %v3344_v50  ;;  %v1925_v52 = vmax.f32 %v1909_v56, 0.0  ;;  %v1896_v4 = vadd.f32 %v4085_v2, %v1771_v30  ;;  %2801 = vmatprep.mubr.bf16.mxu0 %v1984_v41  ;;  %v1914_v34 = vadd.f32 %v4599_v54, %v1898_v45 }
 0x448   :  { %v2780_v7 = vpop.f32.mrf.mxu1  ;;  %2802 = vmatmul.mubr.bf16.vlgmr.msra.gmra.mxu0 %v1985_v28  ;;  %v1972_v27 = vadd.f32 %v1956_v35, %v1940_v32  ;;  %v1945_v33 = vmul.f32 %v1865_v14, %v3349_v51  ;;  %v1852_v17 = vadd.f32 %v4599_v54, %v1830_v22  ;;  %v1854_v39 = vadd.f32 %v4599_v54, %v1832_v44 }
 0x449   :  { %v1957_v18 = vmul.f32 %v1925_v52, %v3344_v50  ;;  %v1899_v48 = vadd.f32 %v2780_v7, %v4088_v19  ;;  %v1912_v1 = vadd.f32 %v4599_v54, %v1896_v4  ;;  %v1975_v26 = vadd.f32 %v1959_v21, %v1943_v36 }
 0x44a   :  { %v1774_v2 = vpop.f32.mrf.mxu1  ;;  %v1831_v19 = vadd.f32 %v4062_v11, %v4066_v59  ;;  %v1930_v16 = vmax.f32 %v1914_v34, 0.0  ;;  %v1868_v41 = vmax.f32 %v1852_v17, 0.0 }
 0x44b   :  { %v1973_v47 = vadd.f32 %v1957_v18, %v1941_v63  ;;  %v1915_v58 = vadd.f32 %v4599_v54, %v1899_v48  ;;  %v1897_v62 = vadd.f32 %v4091_v20, %v1774_v2  ;;  %v1928_v31 = vmax.f32 %v1912_v1, 0.0 }
 0x44c   :  { %v2783_v5 = vpop.f32.mrf.mxu1  ;;  %v1987_v0 = vpack.c.bf16 %v1975_v26, %v1974_v37  ;;  %v1853_v46 = vadd.f32 %v4599_v54, %v1831_v19  ;;  %v1962_v24 = vmul.f32 %v1930_v16, %v3344_v50  ;;  %v1948_v34 = vmul.f32 %v1868_v41, %v3349_v51 }
 0x44d   :  { %v1931_v38 = vmax.f32 %v1915_v58, 0.0  ;;  %v1913_v29 = vadd.f32 %v4599_v54, %v1897_v62  ;;  %v1902_v9 = vadd.f32 %v2783_v5, %v4094_v3  ;;  %v1960_v20 = vmul.f32 %v1928_v31, %v3344_v50 }
 0x44e   :  { %v1787_v25 = vpop.f32.mrf.mxu1  ;;  %v1986_v11 = vpack.c.bf16 %v1973_v47, %v1972_v27  ;;  %v1855_v3 = vadd.f32 %v4599_v54, %v1833_v57  ;;  %v1869_v52 = vmax.f32 %v1853_v46, 0.0  ;;  %v2143_v19 = vlaneseq  ;;  %v2424_v27 = vld [vmem:[%s4438_s10] ss:$0 sm:$0xff] }
 0x44f   :  { %v1963_v59 = vmul.f32 %v1931_v38, %v3344_v50  ;;  %v1929_v60 = vmax.f32 %v1913_v29, 0.0  ;;  %v1900_v32 = vadd.f32 %v4098_v61, %v1787_v25  ;;  %v1918_v12 = vadd.f32 %v4599_v54, %v1902_v9 }
 0x450   :  { %2805 = vmatprep.mubr.bf16.mxu0 %v1986_v11  ;;  %v2784_v23 = vpop.f32.mrf.mxu1  ;;  %v1946_v61 = vmul.f32 %v1866_v13, %v3349_v51  ;;  %v1976_v55 = vadd.f32 %v1960_v20, %v1944_v43  ;;  %v1871_v21 = vmax.f32 %v1855_v3, 0.0  ;;  %v1870_v43 = vmax.f32 %v1854_v39, 0.0 }
 0x451   :  { %v1961_v42 = vmul.f32 %v1929_v60, %v3344_v50  ;;  %v1916_v53 = vadd.f32 %v4599_v54, %v1900_v32  ;;  %2806 = vmatmul.mubr.bf16.gmra.mxu0 %v1987_v0  ;;  %v1903_v56 = vadd.f32 %v2784_v23, %v4102_v40  ;;  %v1979_v36 = vadd.f32 %v1963_v59, %v1947_v15 }
 0x452   :  { %v1790_v45 = vpop.f32.mrf.mxu1  ;;  %v1978_v8 = vadd.f32 %v1962_v24, %v1946_v61  ;;  %v1934_v35 = vmax.f32 %v1918_v12, 0.0  ;;  %v1951_v48 = vmul.f32 %v1871_v21, %v3349_v51  ;;  %v1949_v14 = vmul.f32 %v1869_v52, %v3349_v51 }
 0x453   :  { %v1977_v63 = vadd.f32 %v1961_v42, %v1945_v33  ;;  %v1932_v6 = vmax.f32 %v1916_v53, 0.0  ;;  %v1901_v30 = vadd.f32 %v4112_v49, %v1790_v45  ;;  %v1919_v28 = vadd.f32 %v4599_v54, %v1903_v56 }
 0x454   :  { %v1989_v18 = vpack.c.bf16 %v1979_v36, %v1978_v8  ;;  %v1966_v22 = vmul.f32 %v1934_v35, %v3344_v50  ;;  %v1950_v57 = vmul.f32 %v1870_v43, %v3349_v51  ;;  %v4198_v37 = vand.u32 127, %v2143_v19 }
 0x455   :  { %v1917_v13 = vadd.f32 %v4599_v54, %v1901_v30  ;;  %v1988_v4 = vpack.c.bf16 %v1977_v63, %v1976_v55  ;;  %v1935_v7 = vmax.f32 %v1919_v28, 0.0  ;;  %v1964_v40 = vmul.f32 %v1932_v6, %v3344_v50 }
 0x456   :  { %v1982_v47 = vadd.f32 %v1966_v22, %v1950_v57  ;;  %vm2145_vm0 = vcmp.lt.s32.totalorder %v4198_v37, 8 }
 0x457   :  { %v1933_v10 = vmax.f32 %v1917_v13, 0.0  ;;  %2809 = vmatprep.mubr.bf16.mxu0 %v1988_v4  ;;  %v1967_v49 = vmul.f32 %v1935_v7, %v3344_v50  ;;  %v1980_v1 = vadd.f32 %v1964_v40, %v1948_v34 }
 0x459   :  { %v1965_v54 = vmul.f32 %v1933_v10, %v3344_v50  ;;  %2810 = vmatmul.mubr.bf16.gmra.mxu0 %v1989_v18  ;;  %v1983_v2 = vadd.f32 %v1967_v49, %v1951_v48 }
 0x45b   :  { %v1981_v26 = vadd.f32 %v1965_v54, %v1949_v14  ;;  %v1991_v62 = vpack.c.bf16 %v1983_v2, %v1982_v47 }
 0x45d   :  { %v1990_v58 = vpack.c.bf16 %v1981_v26, %v1980_v1 }
 0x45f   :  { %2813 = vmatprep.mubr.bf16.mxu0 %v1990_v58 }
 0x461   :  { %2814 = vmatmul.mubr.bf16.gmra.mxu0 %v1991_v62 }
 0x508   :  { %v2803_v31 = vpop.f32.mrf.mxu0 }
 0x509   :  { %v2089_v50 = vadd.f32 %v2803_v31, %v2424_v27 }
 0x50a   :  { %v2080_v51 = vpop.f32.mrf.mxu0 }
 0x50b   :  { %v2081_v5 = vadd.f32 %v2424_v27, %v2080_v51  ;;  %v4206_v16 = vsel %vm2145_vm0, %v2089_v50, -1e+30 }
 0x50c   :  { %2166 = vmax.xlane.f32.xlu1 %v4206_v16  ;;  %v2804_v38 = vpop.f32.mrf.mxu0 }
 0x50d   :  { %v2092_v29 = vadd.f32 %v2804_v38, %v2424_v27  ;;  %v4211_v9 = vsel %vm2145_vm0, %v2081_v5, -1e+30 }
 0x50e   :  { %v2083_v15 = vpop.f32.mrf.mxu0  ;;  %2162 = vmax.xlane.f32.xlu0 %v4211_v9 }
 0x50f   :  { %v2084_v44 = vadd.f32 %v2424_v27, %v2083_v15  ;;  %v4216_v20 = vsel %vm2145_vm0, %v2092_v29, -1e+30 }
 0x510   :  { %2168 = vmax.xlane.f32.xlu1 %v4216_v20 }
 0x511   :  { %v2807_v25 = vpop.f32.mrf.mxu0  ;;  %v4221_v59 = vsel %vm2145_vm0, %v2084_v44, -1e+30 }
 0x512   :  { %v2105_v11 = vadd.f32 %v2807_v25, %v2424_v27  ;;  %2164 = vmax.xlane.f32.xlu0 %v4221_v59 }
 0x513   :  { %v2096_v60 = vpop.f32.mrf.mxu0 }
 0x514   :  { %v2097_v0 = vadd.f32 %v2424_v27, %v2096_v60  ;;  %v4226_v17 = vsel %vm2145_vm0, %v2105_v11, -1e+30 }
 0x515   :  { %v2808_v32 = vpop.f32.mrf.mxu0 }
 0x516   :  { %v2108_v33 = vadd.f32 %v2808_v32, %v2424_v27  ;;  %2174 = vmax.xlane.f32.xlu0 %v4226_v17  ;;  %v4236_v12 = vsel %vm2145_vm0, %v2097_v0, -1e+30 }
 0x517   :  { %v2099_v3 = vpop.f32.mrf.mxu0 }
 0x518   :  { %v2100_v46 = vadd.f32 %v2424_v27, %v2099_v3  ;;  %v4231_v23 = vsel %vm2145_vm0, %v2108_v33, -1e+30 }
 0x519   :  { %2176 = vmax.xlane.f32.xlu1 %v4231_v23  ;;  %v2811_v24 = vpop.f32.mrf.mxu0 }
 0x51a   :  { %v2121_v42 = vadd.f32 %v2811_v24, %v2424_v27  ;;  %2170 = vmax.xlane.f32.xlu0 %v4236_v12  ;;  %v4241_v61 = vsel %vm2145_vm0, %v2100_v46, -1e+30 }
 0x51b   :  { %v2112_v53 = vpop.f32.mrf.mxu0 }
 0x51c   :  { %v2113_v55 = vadd.f32 %v2424_v27, %v2112_v53  ;;  %v4246_v45 = vsel %vm2145_vm0, %v2121_v42, -1e+30 }
 0x51d   :  { %v2812_v39 = vpop.f32.mrf.mxu0  ;;  %2172 = vmax.xlane.f32.xlu1 %v4241_v61 }
 0x51e   :  { %v2124_v56 = vadd.f32 %v2812_v39, %v2424_v27  ;;  %2182 = vmax.xlane.f32.xlu0 %v4246_v45  ;;  %v4256_v41 = vsel %vm2145_vm0, %v2113_v55, -1e+30 }
 0x51f   :  { %v2115_v36 = vpop.f32.mrf.mxu0 }
 0x520   :  { %v2116_v63 = vadd.f32 %v2424_v27, %v2115_v36  ;;  %v4251_v6 = vsel %vm2145_vm0, %v2124_v56, -1e+30 }
 0x521   :  { %v2815_v30 = vpop.f32.mrf.mxu0  ;;  %2184 = vmax.xlane.f32.xlu1 %v4251_v6 }
 0x522   :  { %2178 = vmax.xlane.f32.xlu0 %v4256_v41  ;;  %v4261_v28 = vsel %vm2145_vm0, %v2116_v63, -1e+30  ;;  %v2137_v35 = vadd.f32 %v2815_v30, %v2424_v27 }
 0x523   :  { %v2128_v21 = vpop.f32.mrf.mxu0 }
 0x524   :  { %v2129_v52 = vadd.f32 %v2424_v27, %v2128_v21  ;;  %v4275_v10 = vsel %vm2145_vm0, %v2137_v35, -1e+30 }
 0x525   :  { %v2816_v8 = vpop.f32.mrf.mxu0  ;;  %2180 = vmax.xlane.f32.xlu1 %v4261_v28 }
 0x526   :  { %v4266_v13 = vsel %vm2145_vm0, %v2129_v52, -1e+30  ;;  %v2140_v43 = vadd.f32 %v2816_v8, %v2424_v27 }
 0x527   :  { %v2131_v4 = vpop.f32.mrf.mxu0  ;;  %2186 = vmax.xlane.f32.xlu0 %v4266_v13 }
 0x528   :  { %v2132_v7 = vadd.f32 %v2424_v27, %v2131_v4  ;;  %v4281_v18 = vsel %vm2145_vm0, %v2140_v43, -1e+30 }
 0x52a   :  { %v4271_v40 = vsel %vm2145_vm0, %v2132_v7, -1e+30 }
 0x52b   :  { %2188 = vmax.xlane.f32.xlu1 %v4271_v40  ;;  %2190 = vmax.xlane.f32.xlu0 %v4275_v10 }
 0x52f   :  { %2192 = vmax.xlane.f32.xlu1 %v4281_v18 }
 0x595   :  { %v4284_v34 = vpop.xlane.xlu1 %2166 }
 0x596   :  { %v2196_v49 = vsub.f32 %v4206_v16, %v4284_v34 }
 0x597   :  { %v4288_v48 = vpop.xlane.xlu0 %2162 }
 0x598   :  { %v2214_v14 = vmul.f32 1.442695, %v2196_v49  ;;  %v2194_v22 = vsub.f32 %v4211_v9, %v4288_v48 }
 0x599   :  { %v4292_v54 = vpop.xlane.xlu1 %2168 }
 0x59a   :  { %2886 = vpow2.f32 %v2214_v14  ;;  %v2210_v57 = vmul.f32 1.442695, %v2194_v22  ;;  %v2197_v1 = vsub.f32 %v4216_v20, %v4292_v54 }
 0x59b   :  { %v4296_v2 = vpop.xlane.xlu0 %2164 }
 0x59c   :  { %v2216_v26 = vmul.f32 1.442695, %v2197_v1  ;;  %v2195_v47 = vsub.f32 %v4221_v59, %v4296_v2  ;;  %2888 = vpow2.f32 %v2210_v57 }
 0x59e   :  { %2890 = vpow2.f32 %v2216_v26  ;;  %v2212_v58 = vmul.f32 1.442695, %v2195_v47 }
 0x59f   :  { %v4300_v62 = vpop.xlane.xlu0 %2174 }
 0x5a0   :  { %v2200_v19 = vsub.f32 %v4226_v17, %v4300_v62  ;;  %2892 = vpow2.f32 %v2212_v58 }
 0x5a2   :  { %v4304_v37 = vpop.xlane.xlu1 %2176  ;;  %v2222_v27 = vmul.f32 1.442695, %v2200_v19 }
 0x5a3   :  { %v2201_v31 = vsub.f32 %v4231_v23, %v4304_v37  ;;  %v4308_v50 = vpop.xlane.xlu0 %2170 }
 0x5a4   :  { %2894 = vpow2.f32 %v2222_v27  ;;  %v2198_v5 = vsub.f32 %v4236_v12, %v4308_v50 }
 0x5a5   :  { %v2224_v51 = vmul.f32 1.442695, %v2201_v31 }
 0x5a6   :  { %v4312_v38 = vpop.xlane.xlu1 %2172  ;;  %v2218_v29 = vmul.f32 1.442695, %v2198_v5 }
 0x5a7   :  { %2896 = vpow2.f32 %v2224_v51  ;;  %v2199_v15 = vsub.f32 %v4241_v61, %v4312_v38  ;;  %v2887_v44 = vpop.eup %2886  ;;  %v4316_v25 = vpop.xlane.xlu0 %2182 }
 0x5a8   :  { %2898 = vpow2.f32 %v2218_v29  ;;  %v2204_v60 = vsub.f32 %v4246_v45, %v4316_v25  ;;  %2246 = vadd.xlane.f32.xlu0 %v2887_v44 }
 0x5a9   :  { %v2220_v11 = vmul.f32 1.442695, %v2199_v15  ;;  %v2889_v0 = vpop.eup %2888 }
 0x5aa   :  { %v4320_v32 = vpop.xlane.xlu1 %2184  ;;  %v2230_v33 = vmul.f32 1.442695, %v2204_v60 }
 0x5ab   :  { %2900 = vpow2.f32 %v2220_v11  ;;  %v2205_v3 = vsub.f32 %v4251_v6, %v4320_v32  ;;  %v2891_v46 = vpop.eup %2890  ;;  %v4324_v24 = vpop.xlane.xlu0 %2178 }
 0x5ac   :  { %2902 = vpow2.f32 %v2230_v33  ;;  %v2202_v53 = vsub.f32 %v4256_v41, %v4324_v24  ;;  %2248 = vadd.xlane.f32.xlu1 %v2891_v46  ;;  %2242 = vadd.xlane.f32.xlu0 %v2889_v0 }
 0x5ad   :  { %v2232_v42 = vmul.f32 1.442695, %v2205_v3  ;;  %v2893_v36 = vpop.eup %2892 }
 0x5ae   :  { %v4328_v39 = vpop.xlane.xlu1 %2180  ;;  %v2226_v55 = vmul.f32 1.442695, %v2202_v53 }
 0x5af   :  { %2904 = vpow2.f32 %v2232_v42  ;;  %v2203_v56 = vsub.f32 %v4261_v28, %v4328_v39 }
 0x5b0   :  { %v4332_v63 = vpop.xlane.xlu0 %2186  ;;  %2906 = vpow2.f32 %v2226_v55  ;;  %2244 = vadd.xlane.f32.xlu1 %v2893_v36 }
 0x5b1   :  { %v2228_v30 = vmul.f32 1.442695, %v2203_v56  ;;  %v2206_v21 = vsub.f32 %v4266_v13, %v4332_v63  ;;  %v2895_v52 = vpop.eup %2894 }
 0x5b2   :  { %2254 = vadd.xlane.f32.xlu0 %v2895_v52 }
 0x5b3   :  { %2908 = vpow2.f32 %v2228_v30  ;;  %v2234_v8 = vmul.f32 1.442695, %v2206_v21 }
 0x5b4   :  { %v2897_v35 = vpop.eup %2896  ;;  %v4336_v4 = vpop.xlane.xlu1 %2188 }
 0x5b5   :  { %v4338_v7 = vpop.xlane.xlu0 %2190  ;;  %2910 = vpow2.f32 %v2234_v8  ;;  %v2207_v43 = vsub.f32 %v4271_v40, %v4336_v4  ;;  %2256 = vadd.xlane.f32.xlu1 %v2897_v35  ;;  %v2899_v14 = vpop.eup %2898 }
 0x5b6   :  { %v2208_v49 = vsub.f32 %v4275_v10, %v4338_v7  ;;  %2250 = vadd.xlane.f32.xlu0 %v2899_v14 }
 0x5b7   :  { %v2236_v22 = vmul.f32 1.442695, %v2207_v43 }
 0x5b8   :  { %v2238_v57 = vmul.f32 1.442695, %v2208_v49  ;;  %v2901_v1 = vpop.eup %2900  ;;  %v4344_v26 = vpop.xlane.xlu1 %2192 }
 0x5b9   :  { %2912 = vpow2.f32 %v2236_v22  ;;  %v2209_v47 = vsub.f32 %v4281_v18, %v4344_v26  ;;  %2252 = vadd.xlane.f32.xlu1 %v2901_v1  ;;  %v2903_v58 = vpop.eup %2902 }
 0x5ba   :  { %2914 = vpow2.f32 %v2238_v57  ;;  %2262 = vadd.xlane.f32.xlu0 %v2903_v58 }
 0x5bb   :  { %v2240_v19 = vmul.f32 1.442695, %v2209_v47 }
 0x5bc   :  { %v2905_v27 = vpop.eup %2904 }
 0x5bd   :  { %2916 = vpow2.f32 %v2240_v19  ;;  %2264 = vadd.xlane.f32.xlu1 %v2905_v27  ;;  %v2907_v31 = vpop.eup %2906 }
 0x5be   :  { %2258 = vadd.xlane.f32.xlu0 %v2907_v31 }
 0x5c0   :  { %v2909_v51 = vpop.eup %2908 }
 0x5c1   :  { %2260 = vadd.xlane.f32.xlu1 %v2909_v51 }
 0x5c2   :  { %v2911_v5 = vpop.eup %2910 }
 0x5c3   :  { %2266 = vadd.xlane.f32.xlu0 %v2911_v5 }
 0x5c6   :  { %v2913_v29 = vpop.eup %2912 }
 0x5c7   :  { %v2915_v15 = vpop.eup %2914  ;;  %2268 = vadd.xlane.f32.xlu1 %v2913_v29 }
 0x5c8   :  { %2270 = vadd.xlane.f32.xlu0 %v2915_v15 }
 0x5ca   :  { %v2917_v44 = vpop.eup %2916 }
 0x5cb   :  { %2272 = vadd.xlane.f32.xlu1 %v2917_v44 }
 0x631   :  { %v2247_v11 = vpop.xlane.xlu0 %2246 }
 0x632   :  { %2918 = vlog2.f32 %v2247_v11 }
 0x635   :  { %v2249_v60 = vpop.xlane.xlu1 %2248  ;;  %v2243_v0 = vpop.xlane.xlu0 %2242 }
 0x636   :  { %2920 = vlog2.f32 %v2249_v60 }
 0x637   :  { %2922 = vlog2.f32 %v2243_v0 }
 0x639   :  { %v2245_v33 = vpop.xlane.xlu1 %2244 }
 0x63a   :  { %2924 = vlog2.f32 %v2245_v33 }
 0x63b   :  { %v2255_v3 = vpop.xlane.xlu0 %2254 }
 0x63c   :  { %2926 = vlog2.f32 %v2255_v3 }
 0x63e   :  { %v2257_v46 = vpop.xlane.xlu1 %2256 }
 0x63f   :  { %2928 = vlog2.f32 %v2257_v46  ;;  %v2919_v42 = vpop.eup %2918  ;;  %v2251_v53 = vpop.xlane.xlu0 %2250 }
 0x640   :  { %v2279_v55 = vmul.f32 0.6931472, %v2919_v42  ;;  %2930 = vlog2.f32 %v2251_v53 }
 0x642   :  { %v2253_v56 = vpop.xlane.xlu1 %2252  ;;  %v2308_v36 = vadd.f32 %v2279_v55, %v4284_v34 }
 0x643   :  { %2932 = vlog2.f32 %v2253_v56  ;;  %v2921_v30 = vpop.eup %2920  ;;  %v2263_v21 = vpop.xlane.xlu0 %2262 }
 0x644   :  { %v2923_v52 = vpop.eup %2922  ;;  %v2324_v8 = vsub.f32 %v4206_v16, %v2308_v36  ;;  %v2281_v35 = vmul.f32 0.6931472, %v2921_v30  ;;  %2934 = vlog2.f32 %v2263_v21 }
 0x645   :  { %v2275_v43 = vmul.f32 0.6931472, %v2923_v52 }
 0x646   :  { %v2265_v49 = vpop.xlane.xlu1 %2264  ;;  %2340 = vst [vmem:[%s4439_s11 + $0x10] sm:$0xff] %v2324_v8  ;;  %v2309_v14 = vadd.f32 %v2281_v35, %v4292_v54 }
 0x647   :  { %2936 = vlog2.f32 %v2265_v49  ;;  %v2925_v22 = vpop.eup %2924  ;;  %v2306_v34 = vadd.f32 %v2275_v43, %v4288_v48  ;;  %v2259_v57 = vpop.xlane.xlu0 %2258 }
 0x648   :  { %v2325_v1 = vsub.f32 %v4216_v20, %v2309_v14  ;;  %v2277_v47 = vmul.f32 0.6931472, %v2925_v22  ;;  %2938 = vlog2.f32 %v2259_v57 }
 0x649   :  { %v2927_v16 = vpop.eup %2926  ;;  %v2322_v58 = vsub.f32 %v4211_v9, %v2306_v34 }
 0x64a   :  { %v2261_v19 = vpop.xlane.xlu1 %2260  ;;  %2341 = vst [vmem:[%s4439_s11 + $0x18] sm:$0xff] %v2325_v1  ;;  %v2307_v27 = vadd.f32 %v2277_v47, %v4296_v2  ;;  %v2287_v54 = vmul.f32 0.6931472, %v2927_v16 }
 0x64b   :  { %2940 = vlog2.f32 %v2261_v19  ;;  %2338 = vst [vmem:[%s4439_s11] sm:$0xff] %v2322_v58 }
 0x64c   :  { %v2929_v31 = vpop.eup %2928  ;;  %v2267_v20 = vpop.xlane.xlu0 %2266  ;;  %v2323_v48 = vsub.f32 %v4221_v59, %v2307_v27  ;;  %v2312_v51 = vadd.f32 %v2287_v54, %v4300_v62 }
 0x64d   :  { %v2289_v9 = vmul.f32 0.6931472, %v2929_v31  ;;  %2942 = vlog2.f32 %v2267_v20  ;;  %v2931_v5 = vpop.eup %2930 }
 0x64e   :  { %2339 = vst [vmem:[%s4439_s11 + $0x8] sm:$0xff] %v2323_v48  ;;  %v2328_v2 = vsub.f32 %v4226_v17, %v2312_v51  ;;  %v2283_v15 = vmul.f32 0.6931472, %v2931_v5 }
 0x64f   :  { %v2313_v29 = vadd.f32 %v2289_v9, %v4304_v37 }
 0x650   :  { %v2933_v44 = vpop.eup %2932  ;;  %v2269_v11 = vpop.xlane.xlu1 %2268  ;;  %2344 = vst [vmem:[%s4439_s11 + $0x30] sm:$0xff] %v2328_v2  ;;  %v2310_v62 = vadd.f32 %v2283_v15, %v4308_v50 }
 0x651   :  { %v2329_v59 = vsub.f32 %v4231_v23, %v2313_v29  ;;  %v2285_v60 = vmul.f32 0.6931472, %v2933_v44  ;;  %2944 = vlog2.f32 %v2269_v11  ;;  %v2271_v0 = vpop.xlane.xlu0 %2270  ;;  %v2935_v33 = vpop.eup %2934 }
 0x652   :  { %2946 = vlog2.f32 %v2271_v0  ;;  %v2326_v17 = vsub.f32 %v4236_v12, %v2310_v62  ;;  %v2295_v3 = vmul.f32 0.6931472, %v2935_v33 }
 0x653   :  { %2345 = vst [vmem:[%s4439_s11 + $0x38] sm:$0xff] %v2329_v59  ;;  %v2311_v37 = vadd.f32 %v2285_v60, %v4312_v38 }
 0x654   :  { %v2937_v46 = vpop.eup %2936  ;;  %v2273_v42 = vpop.xlane.xlu1 %2272  ;;  %2342 = vst [vmem:[%s4439_s11 + $0x20] sm:$0xff] %v2326_v17  ;;  %v2316_v50 = vadd.f32 %v2295_v3, %v4316_v25 }
 0x655   :  { %v2327_v23 = vsub.f32 %v4241_v61, %v2311_v37  ;;  %v2297_v53 = vmul.f32 0.6931472, %v2937_v46  ;;  %2948 = vlog2.f32 %v2273_v42  ;;  %v2939_v55 = vpop.eup %2938 }
 0x656   :  { %v2332_v12 = vsub.f32 %v4246_v45, %v2316_v50  ;;  %v2291_v56 = vmul.f32 0.6931472, %v2939_v55 }
 0x657   :  { %2343 = vst [vmem:[%s4439_s11 + $0x28] sm:$0xff] %v2327_v23  ;;  %v2317_v38 = vadd.f32 %v2297_v53, %v4320_v32 }
 0x658   :  { %v2941_v36 = vpop.eup %2940  ;;  %2348 = vst [vmem:[%s4439_s11 + $0x50] sm:$0xff] %v2332_v12  ;;  %v2314_v25 = vadd.f32 %v2291_v56, %v4324_v24 }
 0x659   :  { %v2333_v61 = vsub.f32 %v4251_v6, %v2317_v38  ;;  %v2293_v30 = vmul.f32 0.6931472, %v2941_v36 }
 0x65a   :  { %v2943_v21 = vpop.eup %2942  ;;  %v2330_v45 = vsub.f32 %v4256_v41, %v2314_v25 }
 0x65b   :  { %2349 = vst [vmem:[%s4439_s11 + $0x58] sm:$0xff] %v2333_v61  ;;  %v2315_v32 = vadd.f32 %v2293_v30, %v4328_v39  ;;  %v2299_v52 = vmul.f32 0.6931472, %v2943_v21 }
 0x65c   :  { %2346 = vst [vmem:[%s4439_s11 + $0x40] sm:$0xff] %v2330_v45 }
 0x65d   :  { %v2331_v8 = vsub.f32 %v4261_v28, %v2315_v32  ;;  %v2318_v6 = vadd.f32 %v2299_v52, %v4332_v63 }
 0x65e   :  { %v2945_v24 = vpop.eup %2944 }
 0x65f   :  { %v2947_v35 = vpop.eup %2946  ;;  %2347 = vst [vmem:[%s4439_s11 + $0x48] sm:$0xff] %v2331_v8  ;;  %v2334_v43 = vsub.f32 %v4266_v13, %v2318_v6  ;;  %v2301_v41 = vmul.f32 0.6931472, %v2945_v24 }
 0x660   :  { %v2303_v49 = vmul.f32 0.6931472, %v2947_v35 }
 0x661   :  { %2350 = vst [vmem:[%s4439_s11 + $0x60] sm:$0xff] %v2334_v43  ;;  %v2319_v39 = vadd.f32 %v2301_v41, %v4336_v4 }
 0x662   :  { %v2949_v14 = vpop.eup %2948  ;;  %v2320_v28 = vadd.f32 %v2303_v49, %v4338_v7 }
 0x663   :  { %v2335_v63 = vsub.f32 %v4271_v40, %v2319_v39  ;;  %v2305_v22 = vmul.f32 0.6931472, %v2949_v14 }
 0x664   :  { %v2336_v34 = vsub.f32 %v4275_v10, %v2320_v28 }
 0x665   :  { %2351 = vst [vmem:[%s4439_s11 + $0x68] sm:$0xff] %v2335_v63  ;;  %v2321_v13 = vadd.f32 %v2305_v22, %v4344_v26 }
 0x666   :  { %2352 = vst [vmem:[%s4439_s11 + $0x70] sm:$0xff] %v2336_v34 }
 0x667   :  { %v2337_v4 = vsub.f32 %v4281_v18, %v2321_v13 }
 0x669   :  { %2353 = vst [vmem:[%s4439_s11 + $0x78] sm:$0xff] %v2337_v4 }
 0x66a   :  { %2358 = vsyncpa [#allocation6], 1 }

</bundles_post_ra>
